<compile_context>
chip_gen: v5e
topology: v5e:2x2
jax: 0.10.0
libtpu: 0.0.40
codegen_flags: <defaults>
</compile_context>

<pallas_src>
import jax
import jax.numpy as jnp
from jax.experimental import pallas as pl
from jax.experimental.pallas import tpu as pltpu

# ----------------------------- config (scaled-down ESM-1b) -----------------------------
VOCAB = 33      # ESM alphabet size
D = 32          # embed dim        (ESM-1b: 1280)
H = 2           # attention heads  (ESM-1b: 20)
DH = D // H
FFN = 64        # ffn hidden dim   (ESM-1b: 5120)
LAYERS = 2      # encoder layers   (ESM-1b: 33)
CATEGORY = 4    # classifier output size
EPS = 1e-5


def _layernorm(x, g, b):
    mu = jnp.mean(x, axis=-1, keepdims=True)
    var = jnp.mean((x - mu) ** 2, axis=-1, keepdims=True)
    return (x - mu) * jax.lax.rsqrt(var + EPS) * g + b


# ----------------------------- fused Pallas kernel + wrapper -----------------------------
def fused_encoder_and_head(x2, params, *, B, S, b_tiles=1):
    """x2: (B*S, D) float32 embeddings (post embedding-LN) -> (B, CATEGORY) float32 logits.

    One pallas_call: grid=(b_tiles, LAYERS); activations resident in VMEM across layers;
    classification head fused into the last layer step.
    """
    assert B % b_tiles == 0
    BB = B // b_tiles          # batch elements per (parallel) batch tile
    rows = BB * S              # matmul M dimension per tile

    stacked = params["layers_stacked"]            # 16 arrays, each (LAYERS, ...)
    head = (params["final_ln_g"], params["final_ln_b"],
            params["head_w"], params["head_b"])

    def stacked_spec(per_layer_shape):
        """Stream one layer's slice of a (LAYERS, ...) stacked weight per layer step."""
        nd = len(per_layer_shape)
        return pl.BlockSpec((None,) + tuple(per_layer_shape),
                            lambda b, l, nd=nd: (l,) + (0,) * nd)

    def resident_spec(shape):
        """Full array, constant index map (loaded once, resident for the whole grid)."""
        nd = len(shape)
        return pl.BlockSpec(tuple(shape), lambda b, l, nd=nd: (0,) * nd)

    in_specs = [pl.BlockSpec(memory_space=pl.ANY)]          # embeddings: raw HBM ref
    in_specs += [stacked_spec(w.shape[1:]) for w in stacked]
    in_specs += [resident_spec(p.shape) for p in head]

    def kernel(x_hbm,
               ln1g, ln1b, wq, bq, wk, bk, wv, bv, wo, bo,
               ln2g, ln2b, w1, b1, w2, b2,
               flng, flnb, wc, bc,
               out_ref, act_ref, copy_sem):
        b = pl.program_id(0)                      # batch tile (parallel)
        layer = pl.program_id(1)                  # encoder layer (arbitrary / sequential)

        # ---- one-time DMA of this batch tile's embeddings into the resident scratch ----
        @pl.when(layer == 0)
        def _():
            start = pl.multiple_of(b * rows, 8)
            cp = pltpu.make_async_copy(x_hbm.at[pl.ds(start, rows)], act_ref, copy_sem)
            cp.start()
            cp.wait()

        x = act_ref[...]                          # (rows, D) f32, resident across layers

        # ---------------- self-attention sub-block (pre layer norm) ----------------
        h = _layernorm(x, ln1g[...], ln1b[...]).astype(jnp.bfloat16)   # bf16 only at matmul
        scale = jnp.float32(1.0 / (DH ** 0.5))
        q = (jnp.dot(h, wq[...], preferred_element_type=jnp.float32) + bq[...]) * scale
        k = jnp.dot(h, wk[...], preferred_element_type=jnp.float32) + bk[...]
        v = jnp.dot(h, wv[...], preferred_element_type=jnp.float32) + bv[...]

        def split_heads(t):   # (rows, D) -> (H*BB, S, DH), head-major layout plumbing only
            return jnp.concatenate(
                [t[:, hh * DH:(hh + 1) * DH].reshape(BB, S, DH) for hh in range(H)],
                axis=0)

        qh = split_heads(q).astype(jnp.bfloat16)
        kh = split_heads(k).astype(jnp.bfloat16)
        vh = split_heads(v).astype(jnp.bfloat16)

        # single batched-head score / context matmuls (MXU-filling at real scale)
        s = jnp.einsum('bqd,bkd->bqk', qh, kh,
                       preferred_element_type=jnp.float32)             # (H*BB, S, S) f32
        s = s - jnp.max(s, axis=-1, keepdims=True)
        p = jnp.exp(s)
        p = p / jnp.sum(p, axis=-1, keepdims=True)                     # exact softmax denom
        oh = jnp.einsum('bqk,bkd->bqd', p.astype(jnp.bfloat16), vh,
                        preferred_element_type=jnp.float32)            # (H*BB, S, DH)

        # merge heads back into the lane dim once, then ONE matmul with Wo
        o = jnp.concatenate(
            [oh[hh * BB:(hh + 1) * BB].reshape(rows, DH) for hh in range(H)], axis=-1)
        attn = jnp.dot(o.astype(jnp.bfloat16), wo[...],
                       preferred_element_type=jnp.float32) + bo[...]
        x = x + attn

        # ---------------- feed-forward sub-block (pre layer norm) ----------------
        h2 = _layernorm(x, ln2g[...], ln2b[...]).astype(jnp.bfloat16)
        f = jnp.dot(h2, w1[...], preferred_element_type=jnp.float32) + b1[...]
        f = jax.nn.gelu(f, approximate=True)                           # f32 elementwise
        f = jnp.dot(f.astype(jnp.bfloat16), w2[...],
                    preferred_element_type=jnp.float32) + b2[...]
        x = x + f

        act_ref[...] = x                          # stays in VMEM for the next layer

        # ---------------- classification head, fused into the final layer ----------------
        @pl.when(layer == pl.num_programs(1) - 1)
        def _():
            cls = x.reshape(BB, S, D)[:, 0, :]    # representations[33][:, 0, :]
            c = _layernorm(cls, flng[...], flnb[...])      # emb_layer_norm_after (CLS only)
            c = jnp.maximum(c, 0.0)                        # nn.ReLU
            out_ref[...] = (jnp.dot(c.astype(jnp.bfloat16), wc[...],
                                    preferred_element_type=jnp.float32) + bc[...])

    return pl.pallas_call(
        kernel,
        out_shape=jax.ShapeDtypeStruct((B, CATEGORY), jnp.float32),
        grid=(b_tiles, LAYERS),
        in_specs=in_specs,
        out_specs=pl.BlockSpec((BB, CATEGORY), lambda b, l: (b, 0)),
        scratch_shapes=[pltpu.VMEM((rows, D), jnp.float32),
                        pltpu.SemaphoreType.DMA(())],
        compiler_params=pltpu.CompilerParams(
            dimension_semantics=("parallel", "arbitrary"),
            vmem_limit_bytes=56 * 1024 * 1024),
    )(x2, *stacked, *head)


def fungenetyper_forward(tokens, params):
    """Equivalent of FunGeneTyper.forward(data) on a synthetic ESM-style encoder."""
    B, S = tokens.shape
    # glue: token + learned positional embedding (gather) and embedding layer norm in XLA
    x = params["tok_emb"][tokens] + params["pos_emb"][:S][None, :, :]
    x = _layernorm(x, params["emb_ln_g"], params["emb_ln_b"])
    x2 = x.reshape(B * S, D).astype(jnp.float32)
    # encoder stack + ReLU/Linear head — one fused Pallas kernel
    return fused_encoder_and_head(x2, params, B=B, S=S, b_tiles=1)


# ----------------------------- deterministic parameter init -----------------------------
def init_params(key):
    def nrm(k, shape, scale=0.02, dtype=jnp.bfloat16):
        return (scale * jax.random.normal(k, shape)).astype(dtype)

    keys = iter(jax.random.split(key, 8 + LAYERS * 8))
    params = {
        "tok_emb": nrm(next(keys), (VOCAB, D), dtype=jnp.float32),
        "pos_emb": nrm(next(keys), (1024, D), dtype=jnp.float32),
        "emb_ln_g": jnp.ones((1, D), jnp.float32),
        "emb_ln_b": jnp.zeros((1, D), jnp.float32),
        "final_ln_g": jnp.ones((1, D), jnp.float32),
        "final_ln_b": jnp.zeros((1, D), jnp.float32),
        "head_w": nrm(next(keys), (D, CATEGORY)),                       # bf16
        "head_b": jnp.zeros((1, CATEGORY), jnp.float32),
    }
    per_layer = []
    for _ in range(LAYERS):
        per_layer.append([
            jnp.ones((1, D), jnp.float32),  jnp.zeros((1, D), jnp.float32),   # ln1 g/b
            nrm(next(keys), (D, D)),        jnp.zeros((1, D), jnp.float32),   # Wq (bf16), bq
            nrm(next(keys), (D, D)),        jnp.zeros((1, D), jnp.float32),   # Wk (bf16), bk
            nrm(next(keys), (D, D)),        jnp.zeros((1, D), jnp.float32),   # Wv (bf16), bv
            nrm(next(keys), (D, D)),        jnp.zeros((1, D), jnp.float32),   # Wo (bf16), bo
            jnp.ones((1, D), jnp.float32),  jnp.zeros((1, D), jnp.float32),   # ln2 g/b
            nrm(next(keys), (D, FFN)),      jnp.zeros((1, FFN), jnp.float32), # W1 (bf16), b1
            nrm(next(keys), (FFN, D)),      jnp.zeros((1, D), jnp.float32),   # W2 (bf16), b2
        ])
    # stack each weight kind along a leading LAYERS axis for per-layer streaming
    params["layers_stacked"] = [jnp.stack(ws, axis=0) for ws in zip(*per_layer)]
    return params


# ----------------------------- main -----------------------------
if __name__ == "__main__":
    key = jax.random.PRNGKey(0)
    pkey, tkey = jax.random.split(key)
    params = init_params(pkey)

    B, S = 2, 8
    tokens = jax.random.randint(tkey, (B, S), 0, VOCAB, dtype=jnp.int32)
    tokens = tokens.at[:, 0].set(0)  # CLS / BOS token at position 0

    logits = jax.jit(fungenetyper_forward)(tokens, params)
    jax.block_until_ready(logits)
    assert logits.shape == (B, CATEGORY) and logits.dtype == jnp.float32
    print("KERNEL_OK")
</pallas_src>

<mosaic_0001>
module attributes {stable_mosaic.version = 11 : i64} {
  func.func @kernel(%arg0: i32, %arg1: i32, %arg2: memref<16x32xf32, #tpu.memory_space<any>>, %arg3: memref<1x1x32xf32, #tpu.memory_space<vmem>>, %arg4: memref<1x1x32xf32, #tpu.memory_space<vmem>>, %arg5: memref<1x32x32xbf16, #tpu.memory_space<vmem>>, %arg6: memref<1x1x32xf32, #tpu.memory_space<vmem>>, %arg7: memref<1x32x32xbf16, #tpu.memory_space<vmem>>, %arg8: memref<1x1x32xf32, #tpu.memory_space<vmem>>, %arg9: memref<1x32x32xbf16, #tpu.memory_space<vmem>>, %arg10: memref<1x1x32xf32, #tpu.memory_space<vmem>>, %arg11: memref<1x32x32xbf16, #tpu.memory_space<vmem>>, %arg12: memref<1x1x32xf32, #tpu.memory_space<vmem>>, %arg13: memref<1x1x32xf32, #tpu.memory_space<vmem>>, %arg14: memref<1x1x32xf32, #tpu.memory_space<vmem>>, %arg15: memref<1x32x64xbf16, #tpu.memory_space<vmem>>, %arg16: memref<1x1x64xf32, #tpu.memory_space<vmem>>, %arg17: memref<1x64x32xbf16, #tpu.memory_space<vmem>>, %arg18: memref<1x1x32xf32, #tpu.memory_space<vmem>>, %arg19: memref<1x32xf32, #tpu.memory_space<vmem>>, %arg20: memref<1x32xf32, #tpu.memory_space<vmem>>, %arg21: memref<32x4xbf16, #tpu.memory_space<vmem>>, %arg22: memref<1x4xf32, #tpu.memory_space<vmem>>, %arg23: memref<2x4xf32, #tpu.memory_space<vmem>>, %arg24: memref<16x32xf32, #tpu.memory_space<vmem>>, %arg25: memref<!tpu.dma_semaphore, #tpu.memory_space<semaphore_mem>>) attributes {dimension_semantics = [#tpu.dimension_semantics<parallel>, #tpu.dimension_semantics<arbitrary>], iteration_bounds = array<i64: 1, 2>, scalar_prefetch = 0 : i64, scratch_operands = 2 : i64, tpu.core_type = #tpu.core_type<tc>, window_params = [{}, {transform_indices = @transform_1, window_bounds = array<i64: 1, 1, 32>}, {transform_indices = @transform_2, window_bounds = array<i64: 1, 1, 32>}, {transform_indices = @transform_3, window_bounds = array<i64: 1, 32, 32>}, {transform_indices = @transform_4, window_bounds = array<i64: 1, 1, 32>}, {transform_indices = @transform_5, window_bounds = array<i64: 1, 32, 32>}, {transform_indices = @transform_6, window_bounds = array<i64: 1, 1, 32>}, {transform_indices = @transform_7, window_bounds = array<i64: 1, 32, 32>}, {transform_indices = @transform_8, window_bounds = array<i64: 1, 1, 32>}, {transform_indices = @transform_9, window_bounds = array<i64: 1, 32, 32>}, {transform_indices = @transform_10, window_bounds = array<i64: 1, 1, 32>}, {transform_indices = @transform_11, window_bounds = array<i64: 1, 1, 32>}, {transform_indices = @transform_12, window_bounds = array<i64: 1, 1, 32>}, {transform_indices = @transform_13, window_bounds = array<i64: 1, 32, 64>}, {transform_indices = @transform_14, window_bounds = array<i64: 1, 1, 64>}, {transform_indices = @transform_15, window_bounds = array<i64: 1, 64, 32>}, {transform_indices = @transform_16, window_bounds = array<i64: 1, 1, 32>}, {pipeline_mode = #tpu.pipeline_mode<synchronous>, transform_indices = @transform_17, window_bounds = array<i64: 1, 32>}, {pipeline_mode = #tpu.pipeline_mode<synchronous>, transform_indices = @transform_18, window_bounds = array<i64: 1, 32>}, {pipeline_mode = #tpu.pipeline_mode<synchronous>, transform_indices = @transform_19, window_bounds = array<i64: 32, 4>}, {pipeline_mode = #tpu.pipeline_mode<synchronous>, transform_indices = @transform_20, window_bounds = array<i64: 1, 4>}, {transform_indices = @transform_21, window_bounds = array<i64: 2, 4>}]} {
    %c0_i32 = arith.constant 0 : i32
    %0 = arith.cmpi eq, %arg1, %c0_i32 : i32
    %1 = arith.extui %0 : i1 to i32
    %c0_i32_0 = arith.constant 0 : i32
    %2 = arith.cmpi ne, %1, %c0_i32_0 : i32
    scf.if %2 {
      %c16_i32 = arith.constant 16 : i32
      %158 = arith.muli %arg0, %c16_i32 : i32
      %159 = tpu.assume_multiple %158, 8 : i32
      %c0_i32_77 = arith.constant 0 : i32
      %160 = tpu.memref_slice %arg2[%159, %c0_i32_77] : memref<16x32xf32, #tpu.memory_space<any>> -> memref<16x32xf32, #tpu.memory_space<any>>
      tpu.enqueue_dma source(%160 : memref<16x32xf32, #tpu.memory_space<any>>) target(%arg24 : memref<16x32xf32, #tpu.memory_space<vmem>>) target_semaphore(%arg25 : memref<!tpu.dma_semaphore, #tpu.memory_space<semaphore_mem>>)
      %c0_i32_78 = arith.constant 0 : i32
      %161 = tpu.memref_slice %arg2[%159, %c0_i32_78] : memref<16x32xf32, #tpu.memory_space<any>> -> memref<16x32xf32, #tpu.memory_space<any>>
      tpu.wait_dma2 semaphore(%arg25 : memref<!tpu.dma_semaphore, #tpu.memory_space<semaphore_mem>>) src(%161 : memref<16x32xf32, #tpu.memory_space<any>>) dst(%arg24 : memref<16x32xf32, #tpu.memory_space<vmem>>)
    } else {
    }
    %c0 = arith.constant 0 : index
    %c0_1 = arith.constant 0 : index
    %3 = vector.load %arg24[%c0, %c0_1] : memref<16x32xf32, #tpu.memory_space<vmem>>, vector<16x32xf32>
    %c0_2 = arith.constant 0 : index
    %c0_3 = arith.constant 0 : index
    %c0_4 = arith.constant 0 : index
    %4 = vector.load %arg3[%c0_2, %c0_3, %c0_4] : memref<1x1x32xf32, #tpu.memory_space<vmem>>, vector<1x1x32xf32>
    %5 = vector.shape_cast %4 : vector<1x1x32xf32> to vector<1x32xf32>
    %c0_5 = arith.constant 0 : index
    %c0_6 = arith.constant 0 : index
    %c0_7 = arith.constant 0 : index
    %6 = vector.load %arg4[%c0_5, %c0_6, %c0_7] : memref<1x1x32xf32, #tpu.memory_space<vmem>>, vector<1x1x32xf32>
    %7 = vector.shape_cast %6 : vector<1x1x32xf32> to vector<1x32xf32>
    %cst = arith.constant dense<0.000000e+00> : vector<16xf32>
    %8 = vector.multi_reduction <add>, %3, %cst [1] : vector<16x32xf32> to vector<16xf32>
    %9 = vector.shape_cast %8 : vector<16xf32> to vector<16x1xf32>
    %cst_8 = arith.constant 3.200000e+01 : f32
    %10 = vector.broadcast %cst_8 : f32 to vector<16x1xf32>
    %11 = arith.divf %9, %10 : vector<16x1xf32>
    %12 = vector.broadcast %11 : vector<16x1xf32> to vector<16x32xf32>
    %13 = arith.subf %3, %12 : vector<16x32xf32>
    %14 = arith.mulf %13, %13 : vector<16x32xf32>
    %cst_9 = arith.constant dense<0.000000e+00> : vector<16xf32>
    %15 = vector.multi_reduction <add>, %14, %cst_9 [1] : vector<16x32xf32> to vector<16xf32>
    %16 = vector.shape_cast %15 : vector<16xf32> to vector<16x1xf32>
    %cst_10 = arith.constant 3.200000e+01 : f32
    %17 = vector.broadcast %cst_10 : f32 to vector<16x1xf32>
    %18 = arith.divf %16, %17 : vector<16x1xf32>
    %19 = vector.broadcast %11 : vector<16x1xf32> to vector<16x32xf32>
    %20 = arith.subf %3, %19 : vector<16x32xf32>
    %cst_11 = arith.constant 9.99999974E-6 : f32
    %21 = vector.broadcast %cst_11 : f32 to vector<16x1xf32>
    %22 = arith.addf %18, %21 : vector<16x1xf32>
    %23 = math.rsqrt %22 : vector<16x1xf32>
    %24 = vector.broadcast %23 : vector<16x1xf32> to vector<16x32xf32>
    %25 = arith.mulf %20, %24 : vector<16x32xf32>
    %26 = vector.broadcast %5 : vector<1x32xf32> to vector<16x32xf32>
    %27 = arith.mulf %25, %26 : vector<16x32xf32>
    %28 = vector.broadcast %7 : vector<1x32xf32> to vector<16x32xf32>
    %29 = arith.addf %27, %28 : vector<16x32xf32>
    %30 = arith.truncf %29 : vector<16x32xf32> to vector<16x32xbf16>
    %c0_12 = arith.constant 0 : index
    %c0_13 = arith.constant 0 : index
    %c0_14 = arith.constant 0 : index
    %31 = vector.load %arg5[%c0_12, %c0_13, %c0_14] : memref<1x32x32xbf16, #tpu.memory_space<vmem>>, vector<1x32x32xbf16>
    %32 = vector.shape_cast %31 : vector<1x32x32xbf16> to vector<32x32xbf16>
    %cst_15 = arith.constant dense<0.000000e+00> : vector<16x32xf32>
    %33 = tpu.matmul %30, %32, %cst_15 {dimension_numbers = #tpu.dot_dimension_numbers<[1], [0], [0], [1], [0, 0, 1, 1], [], []>} : vector<16x32xbf16>, vector<32x32xbf16>, vector<16x32xf32> -> vector<16x32xf32>
    %c0_16 = arith.constant 0 : index
    %c0_17 = arith.constant 0 : index
    %c0_18 = arith.constant 0 : index
    %34 = vector.load %arg6[%c0_16, %c0_17, %c0_18] : memref<1x1x32xf32, #tpu.memory_space<vmem>>, vector<1x1x32xf32>
    %35 = vector.shape_cast %34 : vector<1x1x32xf32> to vector<1x32xf32>
    %36 = vector.broadcast %35 : vector<1x32xf32> to vector<16x32xf32>
    %37 = arith.addf %33, %36 : vector<16x32xf32>
    %cst_19 = arith.constant 2.500000e-01 : f32
    %38 = vector.broadcast %cst_19 : f32 to vector<16x32xf32>
    %39 = arith.mulf %37, %38 : vector<16x32xf32>
    %c0_20 = arith.constant 0 : index
    %c0_21 = arith.constant 0 : index
    %c0_22 = arith.constant 0 : index
    %40 = vector.load %arg7[%c0_20, %c0_21, %c0_22] : memref<1x32x32xbf16, #tpu.memory_space<vmem>>, vector<1x32x32xbf16>
    %41 = vector.shape_cast %40 : vector<1x32x32xbf16> to vector<32x32xbf16>
    %cst_23 = arith.constant dense<0.000000e+00> : vector<16x32xf32>
    %42 = tpu.matmul %30, %41, %cst_23 {dimension_numbers = #tpu.dot_dimension_numbers<[1], [0], [0], [1], [0, 0, 1, 1], [], []>} : vector<16x32xbf16>, vector<32x32xbf16>, vector<16x32xf32> -> vector<16x32xf32>
    %c0_24 = arith.constant 0 : index
    %c0_25 = arith.constant 0 : index
    %c0_26 = arith.constant 0 : index
    %43 = vector.load %arg8[%c0_24, %c0_25, %c0_26] : memref<1x1x32xf32, #tpu.memory_space<vmem>>, vector<1x1x32xf32>
    %44 = vector.shape_cast %43 : vector<1x1x32xf32> to vector<1x32xf32>
    %45 = vector.broadcast %44 : vector<1x32xf32> to vector<16x32xf32>
    %46 = arith.addf %42, %45 : vector<16x32xf32>
    %c0_27 = arith.constant 0 : index
    %c0_28 = arith.constant 0 : index
    %c0_29 = arith.constant 0 : index
    %47 = vector.load %arg9[%c0_27, %c0_28, %c0_29] : memref<1x32x32xbf16, #tpu.memory_space<vmem>>, vector<1x32x32xbf16>
    %48 = vector.shape_cast %47 : vector<1x32x32xbf16> to vector<32x32xbf16>
    %cst_30 = arith.constant dense<0.000000e+00> : vector<16x32xf32>
    %49 = tpu.matmul %30, %48, %cst_30 {dimension_numbers = #tpu.dot_dimension_numbers<[1], [0], [0], [1], [0, 0, 1, 1], [], []>} : vector<16x32xbf16>, vector<32x32xbf16>, vector<16x32xf32> -> vector<16x32xf32>
    %c0_31 = arith.constant 0 : index
    %c0_32 = arith.constant 0 : index
    %c0_33 = arith.constant 0 : index
    %50 = vector.load %arg10[%c0_31, %c0_32, %c0_33] : memref<1x1x32xf32, #tpu.memory_space<vmem>>, vector<1x1x32xf32>
    %51 = vector.shape_cast %50 : vector<1x1x32xf32> to vector<1x32xf32>
    %52 = vector.broadcast %51 : vector<1x32xf32> to vector<16x32xf32>
    %53 = arith.addf %49, %52 : vector<16x32xf32>
    %54 = vector.extract_strided_slice %39 {offsets = [0, 0], sizes = [16, 16], strides = [1, 1]} : vector<16x32xf32> to vector<16x16xf32>
    %55 = vector.shape_cast %54 : vector<16x16xf32> to vector<2x8x16xf32>
    %56 = vector.extract_strided_slice %39 {offsets = [0, 16], sizes = [16, 16], strides = [1, 1]} : vector<16x32xf32> to vector<16x16xf32>
    %57 = vector.shape_cast %56 : vector<16x16xf32> to vector<2x8x16xf32>
    %58 = tpu.concatenate %55, %57 in 0 : vector<2x8x16xf32>, vector<2x8x16xf32> -> vector<4x8x16xf32>
    %59 = arith.truncf %58 : vector<4x8x16xf32> to vector<4x8x16xbf16>
    %60 = vector.extract_strided_slice %46 {offsets = [0, 0], sizes = [16, 16], strides = [1, 1]} : vector<16x32xf32> to vector<16x16xf32>
    %61 = vector.shape_cast %60 : vector<16x16xf32> to vector<2x8x16xf32>
    %62 = vector.extract_strided_slice %46 {offsets = [0, 16], sizes = [16, 16], strides = [1, 1]} : vector<16x32xf32> to vector<16x16xf32>
    %63 = vector.shape_cast %62 : vector<16x16xf32> to vector<2x8x16xf32>
    %64 = tpu.concatenate %61, %63 in 0 : vector<2x8x16xf32>, vector<2x8x16xf32> -> vector<4x8x16xf32>
    %65 = arith.truncf %64 : vector<4x8x16xf32> to vector<4x8x16xbf16>
    %66 = vector.extract_strided_slice %53 {offsets = [0, 0], sizes = [16, 16], strides = [1, 1]} : vector<16x32xf32> to vector<16x16xf32>
    %67 = vector.shape_cast %66 : vector<16x16xf32> to vector<2x8x16xf32>
    %68 = vector.extract_strided_slice %53 {offsets = [0, 16], sizes = [16, 16], strides = [1, 1]} : vector<16x32xf32> to vector<16x16xf32>
    %69 = vector.shape_cast %68 : vector<16x16xf32> to vector<2x8x16xf32>
    %70 = tpu.concatenate %67, %69 in 0 : vector<2x8x16xf32>, vector<2x8x16xf32> -> vector<4x8x16xf32>
    %71 = arith.truncf %70 : vector<4x8x16xf32> to vector<4x8x16xbf16>
    "tpu.trace_start"() <{level = 10 : i32, message = "bqd,bkd->bqk"}> : () -> ()
    %cst_34 = arith.constant dense<0.000000e+00> : vector<4x8x8xf32>
    %72 = tpu.matmul %59, %65, %cst_34 {dimension_numbers = #tpu.dot_dimension_numbers<[2], [2], [1], [1], [0, 0, 0, 1, 1, 1], [0], [0]>} : vector<4x8x16xbf16>, vector<4x8x16xbf16>, vector<4x8x8xf32> -> vector<4x8x8xf32>
    "tpu.trace_stop"() : () -> ()
    %cst_35 = arith.constant dense<0xFF800000> : vector<4x8xf32>
    %73 = vector.multi_reduction <maximumf>, %72, %cst_35 [2] : vector<4x8x8xf32> to vector<4x8xf32>
    %74 = vector.shape_cast %73 : vector<4x8xf32> to vector<4x8x1xf32>
    %75 = vector.broadcast %74 : vector<4x8x1xf32> to vector<4x8x8xf32>
    %76 = arith.subf %72, %75 : vector<4x8x8xf32>
    %77 = math.exp %76 : vector<4x8x8xf32>
    %cst_36 = arith.constant dense<0.000000e+00> : vector<4x8xf32>
    %78 = vector.multi_reduction <add>, %77, %cst_36 [2] : vector<4x8x8xf32> to vector<4x8xf32>
    %79 = vector.shape_cast %78 : vector<4x8xf32> to vector<4x8x1xf32>
    %80 = vector.broadcast %79 : vector<4x8x1xf32> to vector<4x8x8xf32>
    %81 = arith.divf %77, %80 : vector<4x8x8xf32>
    %82 = arith.truncf %81 : vector<4x8x8xf32> to vector<4x8x8xbf16>
    "tpu.trace_start"() <{level = 10 : i32, message = "bqk,bkd->bqd"}> : () -> ()
    %cst_37 = arith.constant dense<0.000000e+00> : vector<4x8x16xf32>
    %83 = tpu.matmul %82, %71, %cst_37 {dimension_numbers = #tpu.dot_dimension_numbers<[2], [1], [1], [2], [0, 0, 0, 1, 1, 2], [0], [0]>} : vector<4x8x8xbf16>, vector<4x8x16xbf16>, vector<4x8x16xf32> -> vector<4x8x16xf32>
    "tpu.trace_stop"() : () -> ()
    %84 = vector.extract_strided_slice %83 {offsets = [0, 0, 0], sizes = [2, 8, 16], strides = [1, 1, 1]} : vector<4x8x16xf32> to vector<2x8x16xf32>
    %85 = vector.shape_cast %84 : vector<2x8x16xf32> to vector<16x16xf32>
    %86 = vector.extract_strided_slice %83 {offsets = [2, 0, 0], sizes = [2, 8, 16], strides = [1, 1, 1]} : vector<4x8x16xf32> to vector<2x8x16xf32>
    %87 = vector.shape_cast %86 : vector<2x8x16xf32> to vector<16x16xf32>
    %88 = tpu.concatenate %85, %87 in 1 : vector<16x16xf32>, vector<16x16xf32> -> vector<16x32xf32>
    %89 = arith.truncf %88 : vector<16x32xf32> to vector<16x32xbf16>
    %c0_38 = arith.constant 0 : index
    %c0_39 = arith.constant 0 : index
    %c0_40 = arith.constant 0 : index
    %90 = vector.load %arg11[%c0_38, %c0_39, %c0_40] : memref<1x32x32xbf16, #tpu.memory_space<vmem>>, vector<1x32x32xbf16>
    %91 = vector.shape_cast %90 : vector<1x32x32xbf16> to vector<32x32xbf16>
    %cst_41 = arith.constant dense<0.000000e+00> : vector<16x32xf32>
    %92 = tpu.matmul %89, %91, %cst_41 {dimension_numbers = #tpu.dot_dimension_numbers<[1], [0], [0], [1], [0, 0, 1, 1], [], []>} : vector<16x32xbf16>, vector<32x32xbf16>, vector<16x32xf32> -> vector<16x32xf32>
    %c0_42 = arith.constant 0 : index
    %c0_43 = arith.constant 0 : index
    %c0_44 = arith.constant 0 : index
    %93 = vector.load %arg12[%c0_42, %c0_43, %c0_44] : memref<1x1x32xf32, #tpu.memory_space<vmem>>, vector<1x1x32xf32>
    %94 = vector.shape_cast %93 : vector<1x1x32xf32> to vector<1x32xf32>
    %95 = vector.broadcast %94 : vector<1x32xf32> to vector<16x32xf32>
    %96 = arith.addf %92, %95 : vector<16x32xf32>
    %97 = arith.addf %3, %96 : vector<16x32xf32>
    %c0_45 = arith.constant 0 : index
    %c0_46 = arith.constant 0 : index
    %c0_47 = arith.constant 0 : index
    %98 = vector.load %arg13[%c0_45, %c0_46, %c0_47] : memref<1x1x32xf32, #tpu.memory_space<vmem>>, vector<1x1x32xf32>
    %99 = vector.shape_cast %98 : vector<1x1x32xf32> to vector<1x32xf32>
    %c0_48 = arith.constant 0 : index
    %c0_49 = arith.constant 0 : index
    %c0_50 = arith.constant 0 : index
    %100 = vector.load %arg14[%c0_48, %c0_49, %c0_50] : memref<1x1x32xf32, #tpu.memory_space<vmem>>, vector<1x1x32xf32>
    %101 = vector.shape_cast %100 : vector<1x1x32xf32> to vector<1x32xf32>
    %cst_51 = arith.constant dense<0.000000e+00> : vector<16xf32>
    %102 = vector.multi_reduction <add>, %97, %cst_51 [1] : vector<16x32xf32> to vector<16xf32>
    %103 = vector.shape_cast %102 : vector<16xf32> to vector<16x1xf32>
    %cst_52 = arith.constant 3.200000e+01 : f32
    %104 = vector.broadcast %cst_52 : f32 to vector<16x1xf32>
    %105 = arith.divf %103, %104 : vector<16x1xf32>
    %106 = vector.broadcast %105 : vector<16x1xf32> to vector<16x32xf32>
    %107 = arith.subf %97, %106 : vector<16x32xf32>
    %108 = arith.mulf %107, %107 : vector<16x32xf32>
    %cst_53 = arith.constant dense<0.000000e+00> : vector<16xf32>
    %109 = vector.multi_reduction <add>, %108, %cst_53 [1] : vector<16x32xf32> to vector<16xf32>
    %110 = vector.shape_cast %109 : vector<16xf32> to vector<16x1xf32>
    %cst_54 = arith.constant 3.200000e+01 : f32
    %111 = vector.broadcast %cst_54 : f32 to vector<16x1xf32>
    %112 = arith.divf %110, %111 : vector<16x1xf32>
    %113 = vector.broadcast %105 : vector<16x1xf32> to vector<16x32xf32>
    %114 = arith.subf %97, %113 : vector<16x32xf32>
    %cst_55 = arith.constant 9.99999974E-6 : f32
    %115 = vector.broadcast %cst_55 : f32 to vector<16x1xf32>
    %116 = arith.addf %112, %115 : vector<16x1xf32>
    %117 = math.rsqrt %116 : vector<16x1xf32>
    %118 = vector.broadcast %117 : vector<16x1xf32> to vector<16x32xf32>
    %119 = arith.mulf %114, %118 : vector<16x32xf32>
    %120 = vector.broadcast %99 : vector<1x32xf32> to vector<16x32xf32>
    %121 = arith.mulf %119, %120 : vector<16x32xf32>
    %122 = vector.broadcast %101 : vector<1x32xf32> to vector<16x32xf32>
    %123 = arith.addf %121, %122 : vector<16x32xf32>
    %124 = arith.truncf %123 : vector<16x32xf32> to vector<16x32xbf16>
    %c0_56 = arith.constant 0 : index
    %c0_57 = arith.constant 0 : index
    %c0_58 = arith.constant 0 : index
    %125 = vector.load %arg15[%c0_56, %c0_57, %c0_58] : memref<1x32x64xbf16, #tpu.memory_space<vmem>>, vector<1x32x64xbf16>
    %126 = vector.shape_cast %125 : vector<1x32x64xbf16> to vector<32x64xbf16>
    %cst_59 = arith.constant dense<0.000000e+00> : vector<16x64xf32>
    %127 = tpu.matmul %124, %126, %cst_59 {dimension_numbers = #tpu.dot_dimension_numbers<[1], [0], [0], [1], [0, 0, 1, 1], [], []>} : vector<16x32xbf16>, vector<32x64xbf16>, vector<16x64xf32> -> vector<16x64xf32>
    %c0_60 = arith.constant 0 : index
    %c0_61 = arith.constant 0 : index
    %c0_62 = arith.constant 0 : index
    %128 = vector.load %arg16[%c0_60, %c0_61, %c0_62] : memref<1x1x64xf32, #tpu.memory_space<vmem>>, vector<1x1x64xf32>
    %129 = vector.shape_cast %128 : vector<1x1x64xf32> to vector<1x64xf32>
    %130 = vector.broadcast %129 : vector<1x64xf32> to vector<16x64xf32>
    %131 = arith.addf %127, %130 : vector<16x64xf32>
    %132 = arith.mulf %131, %131 : vector<16x64xf32>
    %133 = arith.mulf %131, %132 : vector<16x64xf32>
    %cst_63 = arith.constant 4.471500e-02 : f32
    %134 = vector.broadcast %cst_63 : f32 to vector<16x64xf32>
    %135 = arith.mulf %134, %133 : vector<16x64xf32>
    %136 = arith.addf %131, %135 : vector<16x64xf32>
    %cst_64 = arith.constant 0.797884583 : f32
    %137 = vector.broadcast %cst_64 : f32 to vector<16x64xf32>
    %138 = arith.mulf %137, %136 : vector<16x64xf32>
    %139 = math.tanh %138 : vector<16x64xf32>
    %cst_65 = arith.constant 1.000000e+00 : f32
    %140 = vector.broadcast %cst_65 : f32 to vector<16x64xf32>
    %141 = arith.addf %140, %139 : vector<16x64xf32>
    %cst_66 = arith.constant 5.000000e-01 : f32
    %142 = vector.broadcast %cst_66 : f32 to vector<16x64xf32>
    %143 = arith.mulf %142, %141 : vector<16x64xf32>
    %144 = arith.mulf %131, %143 : vector<16x64xf32>
    %145 = arith.truncf %144 : vector<16x64xf32> to vector<16x64xbf16>
    %c0_67 = arith.constant 0 : index
    %c0_68 = arith.constant 0 : index
    %c0_69 = arith.constant 0 : index
    %146 = vector.load %arg17[%c0_67, %c0_68, %c0_69] : memref<1x64x32xbf16, #tpu.memory_space<vmem>>, vector<1x64x32xbf16>
    %147 = vector.shape_cast %146 : vector<1x64x32xbf16> to vector<64x32xbf16>
    %cst_70 = arith.constant dense<0.000000e+00> : vector<16x32xf32>
    %148 = tpu.matmul %145, %147, %cst_70 {dimension_numbers = #tpu.dot_dimension_numbers<[1], [0], [0], [1], [0, 0, 1, 1], [], []>} : vector<16x64xbf16>, vector<64x32xbf16>, vector<16x32xf32> -> vector<16x32xf32>
    %c0_71 = arith.constant 0 : index
    %c0_72 = arith.constant 0 : index
    %c0_73 = arith.constant 0 : index
    %149 = vector.load %arg18[%c0_71, %c0_72, %c0_73] : memref<1x1x32xf32, #tpu.memory_space<vmem>>, vector<1x1x32xf32>
    %150 = vector.shape_cast %149 : vector<1x1x32xf32> to vector<1x32xf32>
    %151 = vector.broadcast %150 : vector<1x32xf32> to vector<16x32xf32>
    %152 = arith.addf %148, %151 : vector<16x32xf32>
    %153 = arith.addf %97, %152 : vector<16x32xf32>
    %c0_74 = arith.constant 0 : index
    %c0_75 = arith.constant 0 : index
    %154 = vector.load %arg24[%c0_74, %c0_75] : memref<16x32xf32, #tpu.memory_space<vmem>>, vector<16x32xf32>
    tpu.vector_store %arg24[%c0_74, %c0_75], %153 {strides = array<i32>} : memref<16x32xf32, #tpu.memory_space<vmem>>, vector<16x32xf32>,
    %c1_i32 = arith.constant 1 : i32
    %155 = arith.cmpi eq, %arg1, %c1_i32 : i32
    %156 = arith.extui %155 : i1 to i32
    %c0_i32_76 = arith.constant 0 : i32
    %157 = arith.cmpi ne, %156, %c0_i32_76 : i32
    scf.if %157 {
      %158 = vector.shape_cast %153 : vector<16x32xf32> to vector<2x8x32xf32>
      %159 = vector.extract_strided_slice %158 {offsets = [0, 0, 0], sizes = [2, 1, 32], strides = [1, 1, 1]} : vector<2x8x32xf32> to vector<2x1x32xf32>
      %160 = vector.shape_cast %159 : vector<2x1x32xf32> to vector<2x32xf32>
      %c0_77 = arith.constant 0 : index
      %c0_78 = arith.constant 0 : index
      %161 = vector.load %arg19[%c0_77, %c0_78] : memref<1x32xf32, #tpu.memory_space<vmem>>, vector<1x32xf32>
      %c0_79 = arith.constant 0 : index
      %c0_80 = arith.constant 0 : index
      %162 = vector.load %arg20[%c0_79, %c0_80] : memref<1x32xf32, #tpu.memory_space<vmem>>, vector<1x32xf32>
      %cst_81 = arith.constant dense<0.000000e+00> : vector<2xf32>
      %163 = vector.multi_reduction <add>, %160, %cst_81 [1] : vector<2x32xf32> to vector<2xf32>
      %164 = vector.shape_cast %163 : vector<2xf32> to vector<2x1xf32>
      %cst_82 = arith.constant 3.200000e+01 : f32
      %165 = vector.broadcast %cst_82 : f32 to vector<2x1xf32>
      %166 = arith.divf %164, %165 : vector<2x1xf32>
      %167 = vector.broadcast %166 : vector<2x1xf32> to vector<2x32xf32>
      %168 = arith.subf %160, %167 : vector<2x32xf32>
      %169 = arith.mulf %168, %168 : vector<2x32xf32>
      %cst_83 = arith.constant dense<0.000000e+00> : vector<2xf32>
      %170 = vector.multi_reduction <add>, %169, %cst_83 [1] : vector<2x32xf32> to vector<2xf32>
      %171 = vector.shape_cast %170 : vector<2xf32> to vector<2x1xf32>
      %cst_84 = arith.constant 3.200000e+01 : f32
      %172 = vector.broadcast %cst_84 : f32 to vector<2x1xf32>
      %173 = arith.divf %171, %172 : vector<2x1xf32>
      %174 = vector.broadcast %166 : vector<2x1xf32> to vector<2x32xf32>
      %175 = arith.subf %160, %174 : vector<2x32xf32>
      %cst_85 = arith.constant 9.99999974E-6 : f32
      %176 = vector.broadcast %cst_85 : f32 to vector<2x1xf32>
      %177 = arith.addf %173, %176 : vector<2x1xf32>
      %178 = math.rsqrt %177 : vector<2x1xf32>
      %179 = vector.broadcast %178 : vector<2x1xf32> to vector<2x32xf32>
      %180 = arith.mulf %175, %179 : vector<2x32xf32>
      %181 = vector.broadcast %161 : vector<1x32xf32> to vector<2x32xf32>
      %182 = arith.mulf %180, %181 : vector<2x32xf32>
      %183 = vector.broadcast %162 : vector<1x32xf32> to vector<2x32xf32>
      %184 = arith.addf %182, %183 : vector<2x32xf32>
      %cst_86 = arith.constant 0.000000e+00 : f32
      %185 = vector.broadcast %cst_86 : f32 to vector<2x32xf32>
      %186 = arith.maximumf %184, %185 : vector<2x32xf32>
      %187 = arith.truncf %186 : vector<2x32xf32> to vector<2x32xbf16>
      %c0_87 = arith.constant 0 : index
      %c0_88 = arith.constant 0 : index
      %188 = vector.load %arg21[%c0_87, %c0_88] : memref<32x4xbf16, #tpu.memory_space<vmem>>, vector<32x4xbf16>
      %cst_89 = arith.constant dense<0.000000e+00> : vector<2x4xf32>
      %189 = tpu.matmul %187, %188, %cst_89 {dimension_numbers = #tpu.dot_dimension_numbers<[1], [0], [0], [1], [0, 0, 1, 1], [], []>} : vector<2x32xbf16>, vector<32x4xbf16>, vector<2x4xf32> -> vector<2x4xf32>
      %c0_90 = arith.constant 0 : index
      %c0_91 = arith.constant 0 : index
      %190 = vector.load %arg22[%c0_90, %c0_91] : memref<1x4xf32, #tpu.memory_space<vmem>>, vector<1x4xf32>
      %191 = vector.broadcast %190 : vector<1x4xf32> to vector<2x4xf32>
      %192 = arith.addf %189, %191 : vector<2x4xf32>
      %c0_92 = arith.constant 0 : index
      %c0_93 = arith.constant 0 : index
      %193 = vector.load %arg23[%c0_92, %c0_93] : memref<2x4xf32, #tpu.memory_space<vmem>>, vector<2x4xf32>
      tpu.vector_store %arg23[%c0_92, %c0_93], %192 {strides = array<i32>} : memref<2x4xf32, #tpu.memory_space<vmem>>, vector<2x4xf32>,
    } else {
    }
    return
  }
  func.func @transform_1(%arg0: i32, %arg1: i32) -> (i32, i32, i32) {
    %c0_i32 = arith.constant 0 : i32
    %c0_i32_0 = arith.constant 0 : i32
    %c0_i32_1 = arith.constant 0 : i32
    return %arg1, %c0_i32, %c0_i32_0 : i32, i32, i32
  }
  func.func @transform_2(%arg0: i32, %arg1: i32) -> (i32, i32, i32) {
    %c0_i32 = arith.constant 0 : i32
    %c0_i32_0 = arith.constant 0 : i32
    %c0_i32_1 = arith.constant 0 : i32
    return %arg1, %c0_i32, %c0_i32_0 : i32, i32, i32
  }
  func.func @transform_3(%arg0: i32, %arg1: i32) -> (i32, i32, i32) {
    %c0_i32 = arith.constant 0 : i32
    %c0_i32_0 = arith.constant 0 : i32
    %c0_i32_1 = arith.constant 0 : i32
    return %arg1, %c0_i32, %c0_i32_0 : i32, i32, i32
  }
  func.func @transform_4(%arg0: i32, %arg1: i32) -> (i32, i32, i32) {
    %c0_i32 = arith.constant 0 : i32
    %c0_i32_0 = arith.constant 0 : i32
    %c0_i32_1 = arith.constant 0 : i32
    return %arg1, %c0_i32, %c0_i32_0 : i32, i32, i32
  }
  func.func @transform_5(%arg0: i32, %arg1: i32) -> (i32, i32, i32) {
    %c0_i32 = arith.constant 0 : i32
    %c0_i32_0 = arith.constant 0 : i32
    %c0_i32_1 = arith.constant 0 : i32
    return %arg1, %c0_i32, %c0_i32_0 : i32, i32, i32
  }
  func.func @transform_6(%arg0: i32, %arg1: i32) -> (i32, i32, i32) {
    %c0_i32 = arith.constant 0 : i32
    %c0_i32_0 = arith.constant 0 : i32
    %c0_i32_1 = arith.constant 0 : i32
    return %arg1, %c0_i32, %c0_i32_0 : i32, i32, i32
  }
  func.func @transform_7(%arg0: i32, %arg1: i32) -> (i32, i32, i32) {
    %c0_i32 = arith.constant 0 : i32
    %c0_i32_0 = arith.constant 0 : i32
    %c0_i32_1 = arith.constant 0 : i32
    return %arg1, %c0_i32, %c0_i32_0 : i32, i32, i32
  }
  func.func @transform_8(%arg0: i32, %arg1: i32) -> (i32, i32, i32) {
    %c0_i32 = arith.constant 0 : i32
    %c0_i32_0 = arith.constant 0 : i32
    %c0_i32_1 = arith.constant 0 : i32
    return %arg1, %c0_i32, %c0_i32_0 : i32, i32, i32
  }
  func.func @transform_9(%arg0: i32, %arg1: i32) -> (i32, i32, i32) {
    %c0_i32 = arith.constant 0 : i32
    %c0_i32_0 = arith.constant 0 : i32
    %c0_i32_1 = arith.constant 0 : i32
    return %arg1, %c0_i32, %c0_i32_0 : i32, i32, i32
  }
  func.func @transform_10(%arg0: i32, %arg1: i32) -> (i32, i32, i32) {
    %c0_i32 = arith.constant 0 : i32
    %c0_i32_0 = arith.constant 0 : i32
    %c0_i32_1 = arith.constant 0 : i32
    return %arg1, %c0_i32, %c0_i32_0 : i32, i32, i32
  }
  func.func @transform_11(%arg0: i32, %arg1: i32) -> (i32, i32, i32) {
    %c0_i32 = arith.constant 0 : i32
    %c0_i32_0 = arith.constant 0 : i32
    %c0_i32_1 = arith.constant 0 : i32
    return %arg1, %c0_i32, %c0_i32_0 : i32, i32, i32
  }
  func.func @transform_12(%arg0: i32, %arg1: i32) -> (i32, i32, i32) {
    %c0_i32 = arith.constant 0 : i32
    %c0_i32_0 = arith.constant 0 : i32
    %c0_i32_1 = arith.constant 0 : i32
    return %arg1, %c0_i32, %c0_i32_0 : i32, i32, i32
  }
  func.func @transform_13(%arg0: i32, %arg1: i32) -> (i32, i32, i32) {
    %c0_i32 = arith.constant 0 : i32
    %c0_i32_0 = arith.constant 0 : i32
    %c0_i32_1 = arith.constant 0 : i32
    return %arg1, %c0_i32, %c0_i32_0 : i32, i32, i32
  }
  func.func @transform_14(%arg0: i32, %arg1: i32) -> (i32, i32, i32) {
    %c0_i32 = arith.constant 0 : i32
    %c0_i32_0 = arith.constant 0 : i32
    %c0_i32_1 = arith.constant 0 : i32
    return %arg1, %c0_i32, %c0_i32_0 : i32, i32, i32
  }
  func.func @transform_15(%arg0: i32, %arg1: i32) -> (i32, i32, i32) {
    %c0_i32 = arith.constant 0 : i32
    %c0_i32_0 = arith.constant 0 : i32
    %c0_i32_1 = arith.constant 0 : i32
    return %arg1, %c0_i32, %c0_i32_0 : i32, i32, i32
  }
  func.func @transform_16(%arg0: i32, %arg1: i32) -> (i32, i32, i32) {
    %c0_i32 = arith.constant 0 : i32
    %c0_i32_0 = arith.constant 0 : i32
    %c0_i32_1 = arith.constant 0 : i32
    return %arg1, %c0_i32, %c0_i32_0 : i32, i32, i32
  }
  func.func @transform_17(%arg0: i32, %arg1: i32) -> (i32, i32) {
    %c0_i32 = arith.constant 0 : i32
    %c0_i32_0 = arith.constant 0 : i32
    %c0_i32_1 = arith.constant 0 : i32
    return %c0_i32, %c0_i32_0 : i32, i32
  }
  func.func @transform_18(%arg0: i32, %arg1: i32) -> (i32, i32) {
    %c0_i32 = arith.constant 0 : i32
    %c0_i32_0 = arith.constant 0 : i32
    %c0_i32_1 = arith.constant 0 : i32
    return %c0_i32, %c0_i32_0 : i32, i32
  }
  func.func @transform_19(%arg0: i32, %arg1: i32) -> (i32, i32) {
    %c0_i32 = arith.constant 0 : i32
    %c0_i32_0 = arith.constant 0 : i32
    %c0_i32_1 = arith.constant 0 : i32
    return %c0_i32, %c0_i32_0 : i32, i32
  }
  func.func @transform_20(%arg0: i32, %arg1: i32) -> (i32, i32) {
    %c0_i32 = arith.constant 0 : i32
    %c0_i32_0 = arith.constant 0 : i32
    %c0_i32_1 = arith.constant 0 : i32
    return %c0_i32, %c0_i32_0 : i32, i32
  }
  func.func @transform_21(%arg0: i32, %arg1: i32) -> (i32, i32) {
    %c0_i32 = arith.constant 0 : i32
    %c0_i32_0 = arith.constant 0 : i32
    return %arg0, %c0_i32 : i32, i32
  }
}

</mosaic_0001>

<bundles_post_ra>
// kernel: fungenetyper_forward.1
= control target key start
LH: loop header
LB: loop body
LE: loop exit
PB: predicated region body
PF: predicated region fallthrough
CT: control target
= control target key end

     0   :  { %s2601_s0 = inlined_call_operand.vmem [shape: f32[16,32], index: 0, kind: input, shape index: {}]   ;;  %s2602_s1 = inlined_call_operand.vmem [shape: f32[2,1,32], index: 1, kind: input, shape index: {}]   ;;  %s2603_s2 = inlined_call_operand.vmem [shape: f32[2,1,32], index: 2, kind: input, shape index: {}]   ;;  %s2604_s3 = inlined_call_operand.vmem [shape: bf16[2,32,32], index: 3, kind: input, shape index: {}]   ;;  %s2605_s4 = inlined_call_operand.vmem [shape: f32[2,1,32], index: 4, kind: input, shape index: {}]   ;;  %s2606_s5 = inlined_call_operand.vmem [shape: bf16[2,32,32], index: 5, kind: input, shape index: {}]   ;;  %s2607_s6 = inlined_call_operand.vmem [shape: f32[2,1,32], index: 6, kind: input, shape index: {}]   ;;  %s2608_s7 = inlined_call_operand.vmem [shape: bf16[2,32,32], index: 7, kind: input, shape index: {}]   ;;  %s2609_s8 = inlined_call_operand.vmem [shape: f32[2,1,32], index: 8, kind: input, shape index: {}]   ;;  %s2610_s9 = inlined_call_operand.vmem [shape: bf16[2,32,32], index: 9, kind: input, shape index: {}]   ;;  %s2611_s10 = inlined_call_operand.vmem [shape: f32[2,1,32], index: 10, kind: input, shape index: {}]   ;;  %s2612_s11 = inlined_call_operand.vmem [shape: f32[2,1,32], index: 11, kind: input, shape index: {}]   ;;  %s2613_s12 = inlined_call_operand.vmem [shape: f32[2,1,32], index: 12, kind: input, shape index: {}]   ;;  %s2614_s13 = inlined_call_operand.vmem [shape: bf16[2,32,64], index: 13, kind: input, shape index: {}]   ;;  %s2615_s14 = inlined_call_operand.vmem [shape: f32[2,1,64], index: 14, kind: input, shape index: {}]   ;;  %s2616_s15 = inlined_call_operand.vmem [shape: bf16[2,64,32], index: 15, kind: input, shape index: {}]   ;;  %s2617_s16 = inlined_call_operand.vmem [shape: f32[2,1,32], index: 16, kind: input, shape index: {}]   ;;  %s2618_s17 = inlined_call_operand.vmem [shape: f32[1,32], index: 17, kind: input, shape index: {}]   ;;  %s2619_s18 = inlined_call_operand.vmem [shape: f32[1,32], index: 18, kind: input, shape index: {}]   ;;  %s2620_s19 = inlined_call_operand.vmem [shape: bf16[32,4], index: 19, kind: input, shape index: {}]   ;;  %s2621_s20 = inlined_call_operand.vmem [shape: f32[1,4], index: 20, kind: input, shape index: {}]   ;;  %s2622_s21 = inlined_call_operand.hbm [shape: f32[2,4], index: 21, kind: output, shape index: {}]  }
   0x1   :  { %2628 = sst [smem:[#allocation13_spill]] %s2601_s0 }
   0x2   :  { %2629 = sst [smem:[#allocation14_spill]] %s2602_s1 }
   0x3   :  { %2630 = sst [smem:[#allocation15_spill]] %s2603_s2 }
   0x4   :  { %2631 = sst [smem:[#allocation16_spill]] %s2604_s3 }
   0x5   :  { %2632 = sst [smem:[#allocation17_spill]] %s2605_s4 }
   0x6   :  { %2633 = sst [smem:[#allocation18_spill]] %s2606_s5 }
   0x7   :  { %2634 = sst [smem:[#allocation19_spill]] %s2608_s7 }
   0x8   :  { %2635 = sst [smem:[#allocation20_spill]] %s2610_s9 }
   0x9   :  { %2636 = sst [smem:[#allocation21_spill]] %s2618_s17 }
   0xa   :  { %2637 = sst [smem:[#allocation22_spill]] %s2619_s18 }
   0xb   :  { %2638 = sst [smem:[#allocation23_spill]] %s2620_s19 }
   0xc   :  { %2639 = sst [smem:[#allocation24_spill]] %s2621_s20 }
   0xd   :  { %2640 = sst [smem:[#allocation25_spill]] %s2622_s21 }
   0xe   :  { %26 = vsyncpa [#allocation5], 0  ;;  %s2303_s2 = smov 0   ;;  %s2305_s25 = smov 0  }
   0xf   :  { %s2307_s26 = smov 0  }
  0x10 LB: > { %2641 = sst [smem:[#allocation9_spill]] %s2179_s2  ;;  %s41_s3 = sadd.s32 1, %s2183_s25  ;;  %s2187_s26 = sphi %s2307_s26, %s32_s26   ;;  %s2183_s25 = sphi %s2305_s25, %s2674_s25   ;;  %s2179_s2 = sphi %s2303_s2, %s2673_s2  }
  0x11   : > { %2642 = sst [smem:[#allocation10_spill]] %s2183_s25  ;;  %p42_p0 = scmp.ge.s32.totalorder %s41_s3, 2 }
  0x12   : > { %2643 = sst [smem:[#allocation11_spill]] %s2187_s26  ;;  %p1926_p1 = scmp.ge.s32.totalorder %s2187_s26, 1 }
  0x13   : > { %p706_p2 = scmp.lt.s32.totalorder %s2187_s26, 3  ;;  %s2676_s3 = smov (%p42_p0, %s41_s3), 0 }
  0x14   : > { %2644 = sst [smem:[#allocation12_spill]] %s2676_s3 }
  0x15   : > { %p707_p3 = pnand %p1926_p1, %p706_p2 }
  0x16   : > { %p814_p4 = scmp.lt.s32.totalorder (!%p707_p3), %s2179_s2, 1  ;;  %s2648_s26 = sld [smem:[#allocation16_spill]] (!%p707_p3) }
  0x17   : > { %710 = sbr.rel (%p707_p3) target bundleno = 2385 (0x951), region = 100  ;;  %s2649_s19 = sld [smem:[#allocation18_spill]] (!%p707_p3) }
  0x18   : > { %s2650_s7 = sld [smem:[#allocation19_spill]] (!%p707_p3) }
  0x19   : > { %s2651_s9 = sld [smem:[#allocation20_spill]] (!%p707_p3) }
  0x1a   : > { %s2652_s23 = sld [smem:[#allocation9_spill]] (!%p707_p3) }
  0x1c   : > { %s2326_s28 = scalar_select %p814_p4, %s2179_s2, 1 }
  0x1e   : > { %s2025_s24 = sshll.u32 %s2326_s28, 4  ;;  %s854_s5 = scalar_lea.vmem %s2612_s11, %s2326_s28 }
  0x1f   : > { %s2344_s20 = scalar_lea.vmem %s2648_s26, %s2025_s24  ;;  %s2349_s2 = scalar_lea.vmem %s2649_s19, %s2025_s24 }
  0x20   : > { %s2358_s1 = scalar_lea.vmem %s2650_s7, %s2025_s24  ;;  %s2367_s29 = scalar_lea.vmem %s2651_s9, %s2025_s24 }
  0x21   : > { %s2384_s3 = scalar_lea.vmem %s2614_s13, %s2025_s24  ;;  %s865_s21 = scalar_lea.vmem %s2615_s14, %s2326_s28 }
  0x22   : > { %s2030_s9 = sshll.u32 %s2326_s28, 5  ;;  %s873_s22 = scalar_lea.vmem %s2617_s16, %s2326_s28 }
  0x23   : > { %s2394_s19 = scalar_lea.vmem %s2616_s15, %s2030_s9  ;;  %p1939_p5 = scmp.ne.s32.totalorder %s2652_s23, 0 }
  0x24   : > { %s2653_s27 = sld [smem:[#allocation13_spill]] (!%p1939_p5) }
  0x25   : > { %878 = sbr.rel (%p1939_p5) target bundleno = 48 (0x30), region = 104 }
  0x2a   : > { %v891_v0 = vld [vmem:[%s2653_s27] sm:$0xff]  ;;  %v893_v1 = vld [vmem:[%s2653_s27 + $0x8] sm:$0xff] }
  0x2b   : > { %892 = vst [vmem:[#allocation2] sm:$0xff] %v891_v0 }
  0x2c   : > { %894 = vst [vmem:[#allocation2 + $0x8] sm:$0xff] %v893_v1 }
  0x2d   : > { %900 = vsyncadd [#allocation3], 256 }
  0x2e   : > { %2171 = dma.done.wait [#allocation3], 256 }
  0x2f   : > { %2172 = vsyncadd [#allocation3], 4294967040 }
  0x30 PF: > { %vm908_vm0 = vcmask 261120   ;;  %v2189_v6 = vmov 32.0   ;;  %v2032_v23 = vld [vmem:[%s2344_s20 + $0x8] sm:$0xff]  ;;  %v2031_v27 = vld [vmem:[%s2344_s20] sm:$0xff]  ;;  %s2656_s17 = sld [smem:[#allocation15_spill]]  ;;  %s2660_s9 = scalar_lea.vmem %s2607_s6, %s2326_s28  ;;  %vm1114_vm8 = vcmask 130048  }
  0x31   : > { %2096 = vrcp.f32 %v2189_v6  ;;  %v2034_v24 = vld [vmem:[%s2349_s2 + $0x8] sm:$0xff]  ;;  %1000 = vmatpush.bf16.msra.mxu0 %v2032_v23  ;;  %v2033_v28 = vld [vmem:[%s2349_s2] sm:$0xff]  ;;  %s2654_s2 = sld [smem:[#allocation14_spill]]  ;;  %s2190_s20 = smov 112   ;;  %vm1295_vm9 = vcmask 1043456   ;;  %vm1191_vm10 = vcmask 64512  }
  0x32   : > { %v2407_v2 = vld [vmem:[#allocation2] sm:$0xff]  ;;  %v2036_v25 = vld [vmem:[%s2358_s1 + $0x8] sm:$0xff]  ;;  %1036 = vmatpush.bf16.msra.mxu1 %v2034_v24  ;;  %s2658_s23 = sld [smem:[#allocation17_spill]]  ;;  %s2661_s0 = scalar_lea.vmem %s2609_s8, %s2326_s28 }
  0x33   : > { %v909_v3 = vsel %vm908_vm0, %v2407_v2, 0.0  ;;  %v2411_v4 = vld [vmem:[#allocation2 + $0x8] sm:$0xff]  ;;  %1070 = vmatpush.bf16.msra.mxu2 %v2036_v25  ;;  %v2035_v30 = vld [vmem:[%s2358_s1] sm:$0xff]  ;;  %s2191_s26 = smov 16   ;;  %s2662_s30 = scalar_lea.vmem %s2611_s10, %s2326_s28 }
  0x34   : > { %910 = vadd.xlane.f32.xlu0 %v909_v3  ;;  %v912_v5 = vsel %vm908_vm0, %v2411_v4, 0.0  ;;  %v2089_v59 = vld [vmem:[%s2660_s9] ss:$0 sm:$0xff]  ;;  %s2664_s25 = sld [smem:[#allocation9_spill]] }
  0x35   : > { %1001 = vmatpush.bf16.msra.mxu0 %v2031_v27  ;;  %v2090_v3 = vld [vmem:[%s2661_s0] ss:$0 sm:$0xff] }
  0x36   : > { %1037 = vmatpush.bf16.msra.mxu1 %v2033_v28  ;;  %s2657_s18 = scalar_lea.vmem %s2656_s17, %s2326_s28 }
  0x37   : > { %v2097_v7 = vpop.eup %2096  ;;  %1071 = vmatpush.bf16.msra.mxu2 %v2035_v30  ;;  %s2655_s1 = scalar_lea.vmem %s2654_s2, %s2326_s28  ;;  %v2087_v53 = vld [vmem:[%s2657_s18] ss:$0 sm:$0xff] }
  0x38   : > { %v916_v8 = vmul.f32 32.0, %v2097_v7  ;;  %vm920_vm1 = vweird.f32 %v2097_v7  ;;  %v2086_v48 = vld [vmem:[%s2655_s1] ss:$0 sm:$0xff]  ;;  %s2659_s7 = scalar_lea.vmem %s2658_s23, %s2326_s28 }
  0x39   : > { %v2088_v58 = vld [vmem:[%s2659_s7] ss:$0 sm:$0xff]  ;;  %s2663_s7 = scalar_lea.vmem %s2613_s12, %s2326_s28 }
  0x3a   : > { %v917_v9 = vsub.f32 1.0, %v916_v8  ;;  %p2010_p6 = scmp.ne.s32.totalorder %s2664_s25, 1 }
  0x3b   : > { %s2665_s9 = sld [smem:[#allocation23_spill]] (!%p2010_p6) }
  0x3c   : > { %913 = vadd.xlane.f32.xlu0 %v912_v5  ;;  %v918_v10 = vmul.f32 %v2097_v7, %v917_v9  ;;  %s2668_s4 = sld [smem:[#allocation24_spill]] (!%p2010_p6) }
  0x3e   : > { %v919_v11 = vadd.f32 %v2097_v7, %v918_v10 }
  0x40   : > { %v2415_v12 = vsel %vm920_vm1, %v2097_v7, %v919_v11 }
  0xa7   : > { %v911_v13 = vpop.xlane.xlu0 %910 }
  0xa8   : > { %v922_v14 = vmul.f32 %v2415_v12, %v911_v13 }
  0xaa   : > { %v924_v15 = vsub.f32 %v2407_v2, %v922_v14 }
  0xac   : > { %v926_v16 = vmul.f32 %v924_v15, %v924_v15 }
  0xae   : > { %v928_v17 = vsel %vm908_vm0, %v926_v16, 0.0 }
  0xaf   : > { %929 = vadd.xlane.f32.xlu1 %v928_v17  ;;  %v914_v18 = vpop.xlane.xlu0 %913 }
  0xb0   : > { %v923_v19 = vmul.f32 %v2415_v12, %v914_v18 }
  0xb2   : > { %v925_v20 = vsub.f32 %v2411_v4, %v923_v19 }
  0xb4   : > { %v927_v21 = vmul.f32 %v925_v20, %v925_v20 }
  0xb6   : > { %v931_v22 = vsel %vm908_vm0, %v927_v21, 0.0 }
  0xb7   : > { %932 = vadd.xlane.f32.xlu1 %v931_v22 }
 0x122   : > { %v930_v26 = vpop.xlane.xlu1 %929 }
 0x123   : > { %v934_v29 = vmul.f32 %v930_v26, %v2415_v12 }
 0x125   : > { %v936_v31 = vadd.f32 1e-05, %v934_v29 }
 0x127   : > { %2098 = vrsqrt.f32 %v936_v31  ;;  %vm944_vm3 = vweird.f32 %v936_v31 }
 0x12a   : > { %v933_v32 = vpop.xlane.xlu1 %932 }
 0x12b   : > { %v935_v33 = vmul.f32 %v933_v32, %v2415_v12 }
 0x12d   : > { %v2099_v34 = vpop.eup %2098  ;;  %v937_v35 = vadd.f32 1e-05, %v935_v33 }
 0x12e   : > { %v939_v36 = vmul.f32 %v2099_v34, %v936_v31  ;;  %vm945_vm2 = vweird.f32 %v2099_v34 }
 0x12f   : > { %2100 = vrsqrt.f32 %v937_v35  ;;  %vm946_vm4 = vmor %vm944_vm3, %vm945_vm2  ;;  %vm954_vm6 = vweird.f32 %v937_v35 }
 0x130   : > { %v940_v37 = vmul.f32 %v2099_v34, %v939_v36 }
 0x132   : > { %v941_v38 = vmul.f32 0.5, %v940_v37 }
 0x134   : > { %v942_v39 = vsub.f32 1.5, %v941_v38 }
 0x135   : > { %v2101_v40 = vpop.eup %2100 }
 0x136   : > { %v943_v41 = vmul.f32 %v2099_v34, %v942_v39  ;;  %v949_v42 = vmul.f32 %v2101_v40, %v937_v35  ;;  %vm955_vm5 = vweird.f32 %v2101_v40 }
 0x137   : > { %vm956_vm7 = vmor %vm954_vm6, %vm955_vm5 }
 0x138   : > { %v950_v43 = vmul.f32 %v2101_v40, %v949_v42  ;;  %v947_v44 = vsel %vm946_vm4, %v2099_v34, %v943_v41 }
 0x139   : > { %v958_v47 = vmul.f32 %v947_v44, %v924_v15 }
 0x13a   : > { %v951_v45 = vmul.f32 0.5, %v950_v43 }
 0x13b   : > { %v963_v52 = vmul.f32 %v2086_v48, %v958_v47 }
 0x13c   : > { %v952_v46 = vsub.f32 1.5, %v951_v45 }
 0x13d   : > { %v968_v55 = vadd.f32 %v2087_v53, %v963_v52 }
 0x13e   : > { %v953_v49 = vmul.f32 %v2101_v40, %v952_v46 }
 0x140   : > { %v957_v50 = vsel %vm956_vm7, %v2101_v40, %v953_v49 }
 0x141   : > { %v959_v51 = vmul.f32 %v957_v50, %v925_v20 }
 0x143   : > { %v964_v54 = vmul.f32 %v2086_v48, %v959_v51 }
 0x145   : > { %v969_v56 = vadd.f32 %v2087_v53, %v964_v54 }
 0x147   : > { %v970_v57 = vpack.c.bf16 %v969_v56, %v968_v55 }
 0x149   : > { %1948 = vmatmul.msk.bf16.vlgmr.msra.gmra.mxu0 %vm908_vm0, %v970_v57  ;;  %1957 = vmatmul.msk.bf16.vlgmr.msra.gmra.mxu1 %vm908_vm0, %v970_v57 }
 0x14a   : > { %1966 = vmatmul.msk.bf16.vlgmr.msra.gmra.mxu2 %vm908_vm0, %v970_v57 }
 0x1c6   : > { %v1003_v60 = vpop.f32.mrf.mxu0  ;;  %v1039_v61 = vpop.f32.mrf.mxu1 }
 0x1c7   : > { %v1004_v62 = vadd.f32 %v2088_v58, %v1003_v60  ;;  %v1040_v63 = vadd.f32 %v2089_v59, %v1039_v61 }
 0x1c9   : > { %v1008_v0 = vmul.f32 0.25, %v1004_v62  ;;  %1092 = vrot.lane.b32.xlu0 %v1040_v63, %s2190_s20  ;;  %v1098_v1 = vpack.c.bf16 %v1040_v63, %v1040_v63 }
 0x1cb   : > { %1080 = vrot.lane.b32.xlu1 %v1008_v0, %s2190_s20  ;;  %v1119_v5 = vsel %vm1114_vm8, %v1098_v1, 0  ;;  %v1086_v14 = vpack.c.bf16 %v1008_v0, %v1008_v0 }
 0x1cc   : > { %1128 = vmatpush.bf16.xpose.msra.mxu3 %v1119_v5 }
 0x1cd   : > { %v1073_v6 = vpop.f32.mrf.mxu2 }
 0x1ce   : > { %v2462_v7 = vadd.f32 %v2090_v3, %v1073_v6  ;;  %v1041_v8 = vpop.f32.mrf.mxu1  ;;  %v1005_v9 = vpop.f32.mrf.mxu0 }
 0x1cf   : > { %v1042_v10 = vadd.f32 %v2089_v59, %v1041_v8  ;;  %v1006_v15 = vadd.f32 %v2088_v58, %v1005_v9 }
 0x1d0   : > { %v1110_v11 = vpack.c.bf16 %v2462_v7, %v2462_v7 }
 0x1d1   : > { %1094 = vrot.lane.b32.xlu2 %v1042_v10, %s2190_s20  ;;  %v1099_v13 = vpack.c.bf16 %v1042_v10, %v1042_v10  ;;  %v1009_v19 = vmul.f32 0.25, %v1006_v15 }
 0x1d2   : > { %v1297_v16 = vsel %vm1295_vm9, %v1110_v11, 0 }
 0x1d3   : > { %v1138_v17 = vsel %vm1114_vm8, %v1099_v13, 0  ;;  %1967 = vmatmul.msk.bf16.vlgmr.msra.gmra.mxu3 %vm1114_vm8, %v1086_v14  ;;  %v1087_v22 = vpack.c.bf16 %v1009_v19, %v1009_v19 }
 0x1d4   : > { %1306 = vmatpush.bf16.msrb.mxu3 %v1297_v16  ;;  %1147 = vmatpush.bf16.xpose.msrb.mxu0 %v1138_v17 }
 0x1d5   : > { %v1075_v18 = vpop.f32.mrf.mxu2 }
 0x1d6   : > { %v1076_v20 = vadd.f32 %v2090_v3, %v1075_v18 }
 0x1d8   : > { %v1111_v21 = vpack.c.bf16 %v1076_v20, %v1076_v20 }
 0x1d9   : > { %1082 = vrot.lane.b32.xlu2 %v1009_v19, %s2190_s20 }
 0x1da   : > { %v1316_v23 = vsel %vm1295_vm9, %v1111_v21, 0 }
 0x1db   : > { %1968 = vmatmul.msk.bf16.vlgmr.msrb.gmra.mxu0 %vm1114_vm8, %v1087_v22 }
 0x1dc   : > { %1325 = vmatpush.bf16.msra.mxu0 %v1316_v23 }
 0x22b   : > { %v1095_v24 = vpop.permute.xlu2 %1094 }
 0x22c   : > { %v1101_v25 = vpack.c.bf16 %v1095_v24, %v1095_v24 }
 0x22e   : > { %v1176_v26 = vsel %vm1114_vm8, %v1101_v25, 0 }
 0x22f   : > { %1185 = vmatpush.bf16.xpose.msrb.mxu2 %v1176_v26 }
 0x233   : > { %v1083_v27 = vpop.permute.xlu2 %1082 }
 0x234   : > { %v1089_v28 = vpack.c.bf16 %v1083_v27, %v1083_v27 }
 0x236   : > { %1970 = vmatmul.msk.bf16.vlgmr.msrb.gmra.mxu2 %vm1114_vm8, %v1089_v28 }
 0x23b   : > { %v1093_v29 = vpop.permute.xlu0 %1092 }
 0x23c   : > { %v1100_v30 = vpack.c.bf16 %v1093_v29, %v1093_v29 }
 0x23d   : > { %v1081_v32 = vpop.permute.xlu1 %1080 }
 0x23e   : > { %v1157_v31 = vsel %vm1114_vm8, %v1100_v30, 0  ;;  %v1088_v33 = vpack.c.bf16 %v1081_v32, %v1081_v32 }
 0x23f   : > { %1166 = vmatpush.bf16.xpose.msrb.mxu1 %v1157_v31 }
 0x246   : > { %1969 = vmatmul.msk.bf16.vlgmr.msrb.gmra.mxu1 %vm1114_vm8, %v1088_v33 }
 0x256   : > { %v1130_v34 = vpop.f32.mrf.mxu3 }
 0x257   : > { %v1192_v35 = vsel %vm1191_vm10, %v1130_v34, -inf }
 0x258   : > { %v1149_v36 = vpop.f32.mrf.mxu0  ;;  %1193 = vmax.xlane.f32.xlu1 %v1192_v35 }
 0x259   : > { %v1195_v42 = vsel %vm1191_vm10, %v1149_v36, -inf }
 0x25e   : > { %v1132_v37 = vpop.f32.mrf.mxu3 }
 0x260   : > { %v1151_v38 = vpop.f32.mrf.mxu0 }
 0x2b9   : > { %v1187_v39 = vpop.f32.mrf.mxu2 }
 0x2ba   : > { %v1201_v40 = vsel %vm1191_vm10, %v1187_v39, -inf }
 0x2bb   : > { %1202 = vmax.xlane.f32.xlu2 %v1201_v40 }
 0x2c1   : > { %v1189_v41 = vpop.f32.mrf.mxu2 }
 0x2c3   : > { %1196 = vmax.xlane.f32.xlu2 %v1195_v42  ;;  %v1168_v43 = vpop.f32.mrf.mxu1 }
 0x2c4   : > { %v1198_v44 = vsel %vm1191_vm10, %v1168_v43, -inf }
 0x2c5   : > { %1199 = vmax.xlane.f32.xlu0 %v1198_v44 }
 0x2cb   : > { %v1170_v45 = vpop.f32.mrf.mxu1  ;;  %v1194_v46 = vpop.xlane.xlu1 %1193 }
 0x2cc   : > { %v1204_v47 = vsub.f32 %v1130_v34, %v1194_v46 }
 0x2ce   : > { %v1208_v48 = vmul.f32 1.442695, %v1204_v47 }
 0x2d0   : > { %2102 = vpow2.f32 %v1208_v48 }
 0x2d6   : > { %v2103_v49 = vpop.eup %2102 }
 0x2d7   : > { %v1216_v50 = vsel %vm1191_vm10, %v2103_v49, 0.0 }
 0x2d8   : > { %1217 = vadd.xlane.f32.xlu1 %v1216_v50 }
 0x2d9   : > { %1106 = vrot.lane.b32.xlu0 %v1076_v20, %s2190_s20 }
 0x32e   : > { %v1203_v51 = vpop.xlane.xlu2 %1202 }
 0x32f   : > { %v1207_v57 = vsub.f32 %v1187_v39, %v1203_v51 }
 0x331   : > { %v1214_v59 = vmul.f32 1.442695, %v1207_v57 }
 0x336   : > { %v1197_v52 = vpop.xlane.xlu2 %1196 }
 0x337   : > { %v1205_v53 = vsub.f32 %v1149_v36, %v1197_v52 }
 0x338   : > { %v1200_v54 = vpop.xlane.xlu0 %1199 }
 0x339   : > { %v1210_v55 = vmul.f32 1.442695, %v1205_v53  ;;  %v1206_v56 = vsub.f32 %v1168_v43, %v1200_v54 }
 0x33b   : > { %2104 = vpow2.f32 %v1210_v55  ;;  %v1212_v58 = vmul.f32 1.442695, %v1206_v56 }
 0x33d   : > { %2106 = vpow2.f32 %v1212_v58 }
 0x33e   : > { %2108 = vpow2.f32 %v1214_v59 }
 0x341   : > { %v2483_v60 = vpop.eup %2104 }
 0x342   : > { %v1219_v61 = vsel %vm1191_vm10, %v2483_v60, 0.0 }
 0x343   : > { %v2487_v62 = vpop.eup %2106  ;;  %1220 = vadd.xlane.f32.xlu1 %v1219_v61 }
 0x344   : > { %v1222_v63 = vsel %vm1191_vm10, %v2487_v62, 0.0  ;;  %v2491_v0 = vpop.eup %2108 }
 0x345   : > { %1223 = vadd.xlane.f32.xlu2 %v1222_v63  ;;  %v1225_v6 = vsel %vm1191_vm10, %v2491_v0, 0.0 }
 0x34b   : > { %v1107_v1 = vpop.permute.xlu0 %1106  ;;  %v1218_v5 = vpop.xlane.xlu1 %1217 }
 0x34c   : > { %v1113_v3 = vpack.c.bf16 %v1107_v1, %v1107_v1  ;;  %2110 = vrcp.f32 %v1218_v5  ;;  %v1239_v13 = vand.u32 2147483648, %v1218_v5  ;;  %v1237_v15 = vand.u32 2147483647, %v1218_v5 }
 0x34d   : > { %1226 = vadd.xlane.f32.xlu2 %v1225_v6  ;;  %vm1233_vm12 = vweird.f32 %v1218_v5 }
 0x34e   : > { %v1354_v8 = vsel %vm1295_vm9, %v1113_v3, 0  ;;  %v1240_v17 = vor.u32 1.1754944e-38, %v1239_v13  ;;  %vm1238_vm14 = vcmp.eq.f32.partialorder %v1237_v15, 8.507059e+37  ;;  %v2038_v3 = vld [vmem:[%s2367_s29 + $0x8] sm:$0xff] }
 0x34f   : > { %1363 = vmatpush.bf16.msra.mxu2 %v1354_v8  ;;  %1409 = vmatpush.bf16.msra.mxu3 %v2038_v3 }
 0x352   : > { %v2111_v9 = vpop.eup %2110 }
 0x353   : > { %v1229_v10 = vmul.f32 %v2111_v9, %v1218_v5  ;;  %vm1234_vm11 = vweird.f32 %v2111_v9 }
 0x354   : > { %vm1235_vm13 = vmor %vm1233_vm12, %vm1234_vm11 }
 0x355   : > { %v1230_v11 = vsub.f32 1.0, %v1229_v10 }
 0x357   : > { %v1231_v14 = vmul.f32 %v2111_v9, %v1230_v11 }
 0x359   : > { %v1232_v16 = vadd.f32 %v2111_v9, %v1231_v14  ;;  %v2037_v14 = vld [vmem:[%s2367_s29] sm:$0xff] }
 0x35a   : > { %1410 = vmatpush.bf16.msra.mxu3 %v2037_v14 }
 0x35b   : > { %v1236_v18 = vsel %vm1235_vm13, %v2111_v9, %v1232_v16 }
 0x35c   : > { %v1241_v19 = vsel %vm1238_vm14, %v1240_v17, %v1236_v18 }
 0x35d   : > { %v1242_v20 = vmul.f32 %v2103_v49, %v1241_v19 }
 0x35f   : > { %v1288_v21 = vpack.c.bf16 %v1242_v20, %v1242_v20  ;;  %v2091_v20 = vld [vmem:[%s2662_s30] ss:$0 sm:$0xff]  ;;  %s2667_s30 = sld [smem:[#allocation22_spill]] (!%p2010_p6) }
 0x361   : > { %1971 = vmatmul.msk.bf16.vlgmr.msrb.gmra.mxu3 %vm1191_vm10, %v1288_v21 }
 0x365   : > { %1104 = vrot.lane.b32.xlu2 %v2462_v7, %s2190_s20 }
 0x3b6   : > { %v1221_v22 = vpop.xlane.xlu1 %1220 }
 0x3b7   : > { %2112 = vrcp.f32 %v1221_v22  ;;  %v1254_v30 = vand.u32 2147483648, %v1221_v22  ;;  %v1252_v32 = vand.u32 2147483647, %v1221_v22  ;;  %vm1248_vm1 = vweird.f32 %v1221_v22 }
 0x3b8   : > { %v1224_v23 = vpop.xlane.xlu2 %1223 }
 0x3b9   : > { %2114 = vrcp.f32 %v1224_v23  ;;  %v1269_v34 = vand.u32 2147483648, %v1224_v23  ;;  %v1267_v36 = vand.u32 2147483647, %v1224_v23  ;;  %v1255_v37 = vor.u32 1.1754944e-38, %v1254_v30 }
 0x3ba   : > { %vm1253_vm4 = vcmp.eq.f32.partialorder %v1252_v32, 8.507059e+37  ;;  %vm1263_vm5 = vweird.f32 %v1224_v23 }
 0x3bb   : > { %v1270_v42 = vor.u32 1.1754944e-38, %v1269_v34  ;;  %vm1268_vm7 = vcmp.eq.f32.partialorder %v1267_v36, 8.507059e+37  ;;  %v2040_v36 = vld [vmem:[%s2384_s3 + $0x8] sm:$0xff] }
 0x3bc   : > { %1505 = vmatpush.bf16.msrb.mxu0 %v2040_v36 }
 0x3bd   : > { %v2113_v24 = vpop.eup %2112 }
 0x3be   : > { %v1244_v25 = vmul.f32 %v2113_v24, %v1221_v22  ;;  %vm1249_vm15 = vweird.f32 %v2113_v24 }
 0x3bf   : > { %v2115_v26 = vpop.eup %2114  ;;  %vm1250_vm3 = vmor %vm1248_vm1, %vm1249_vm15 }
 0x3c0   : > { %v1245_v27 = vsub.f32 1.0, %v1244_v25  ;;  %v1259_v28 = vmul.f32 %v2115_v26, %v1224_v23  ;;  %v1227_v29 = vpop.xlane.xlu2 %1226  ;;  %vm1264_vm2 = vweird.f32 %v2115_v26 }
 0x3c1   : > { %2116 = vrcp.f32 %v1227_v29  ;;  %vm1265_vm6 = vmor %vm1263_vm5, %vm1264_vm2  ;;  %v1284_v52 = vand.u32 2147483648, %v1227_v29  ;;  %v1282_v55 = vand.u32 2147483647, %v1227_v29  ;;  %vm1278_vm12 = vweird.f32 %v1227_v29 }
 0x3c2   : > { %v1246_v31 = vmul.f32 %v2113_v24, %v1245_v27  ;;  %v1260_v33 = vsub.f32 1.0, %v1259_v28 }
 0x3c3   : > { %v1285_v58 = vor.u32 1.1754944e-38, %v1284_v52  ;;  %vm1283_vm14 = vcmp.eq.f32.partialorder %v1282_v55, 8.507059e+37 }
 0x3c4   : > { %v1247_v35 = vadd.f32 %v2113_v24, %v1246_v31  ;;  %v1261_v7 = vmul.f32 %v2115_v26, %v1260_v33 }
 0x3c6   : > { %v1251_v38 = vsel %vm1250_vm3, %v2113_v24, %v1247_v35  ;;  %v1262_v39 = vadd.f32 %v2115_v26, %v1261_v7  ;;  %vm1568_vm3 = vcmask 523264  }
 0x3c7   : > { %v2117_v40 = vpop.eup %2116  ;;  %v1256_v41 = vsel %vm1253_vm4, %v1255_v37, %v1251_v38 }
 0x3c8   : > { %v1257_v43 = vmul.f32 %v2483_v60, %v1256_v41  ;;  %v1266_v44 = vsel %vm1265_vm6, %v2115_v26, %v1262_v39  ;;  %v1274_v45 = vmul.f32 %v2117_v40, %v1227_v29  ;;  %v1105_v46 = vpop.permute.xlu2 %1104  ;;  %vm1279_vm11 = vweird.f32 %v2117_v40 }
 0x3c9   : > { %v1271_v47 = vsel %vm1268_vm7, %v1270_v42, %v1266_v44  ;;  %v1112_v48 = vpack.c.bf16 %v1105_v46, %v1105_v46  ;;  %vm1280_vm13 = vmor %vm1278_vm12, %vm1279_vm11 }
 0x3ca   : > { %v1272_v49 = vmul.f32 %v2487_v62, %v1271_v47  ;;  %v1275_v50 = vsub.f32 1.0, %v1274_v45  ;;  %v1289_v51 = vpack.c.bf16 %v1257_v43, %v1257_v43 }
 0x3cb   : > { %v1335_v53 = vsel %vm1295_vm9, %v1112_v48, 0 }
 0x3cc   : > { %v1276_v54 = vmul.f32 %v2117_v40, %v1275_v50  ;;  %1972 = vmatmul.msk.bf16.vlgmr.msra.gmra.mxu0 %vm1191_vm10, %v1289_v51  ;;  %1344 = vmatpush.bf16.msra.mxu1 %v1335_v53  ;;  %v1290_v56 = vpack.c.bf16 %v1272_v49, %v1272_v49 }
 0x3ce   : > { %v1277_v57 = vadd.f32 %v2117_v40, %v1276_v54 }
 0x3cf   : > { %1973 = vmatmul.msk.bf16.vlgmr.msra.gmra.mxu1 %vm1191_vm10, %v1290_v56  ;;  %v2092_v56 = vld [vmem:[%s854_s5] ss:$0 sm:$0xff] }
 0x3d0   : > { %v1281_v59 = vsel %vm1280_vm13, %v2117_v40, %v1277_v57  ;;  %v2039_v40 = vld [vmem:[%s2384_s3] sm:$0xff] }
 0x3d1   : > { %v1286_v60 = vsel %vm1283_vm14, %v1285_v58, %v1281_v59  ;;  %1506 = vmatpush.bf16.msrb.mxu0 %v2039_v40 }
 0x3d2   : > { %v1287_v61 = vmul.f32 %v2491_v0, %v1286_v60  ;;  %v2093_v60 = vld [vmem:[%s2663_s7] ss:$0 sm:$0xff] }
 0x3d4   : > { %v1291_v62 = vpack.c.bf16 %v1287_v61, %v1287_v61 }
 0x3d6   : > { %1974 = vmatmul.msk.bf16.vlgmr.msra.gmra.mxu2 %vm1191_vm10, %v1291_v62 }
 0x3e4   : > { %v1308_v63 = vpop.f32.mrf.mxu3 }
 0x3ec   : > { %v1310_v1 = vpop.f32.mrf.mxu3 }
 0x449   : > { %v1327_v5 = vpop.f32.mrf.mxu0 }
 0x44c   : > { %v1346_v6 = vpop.f32.mrf.mxu1 }
 0x451   : > { %v1329_v8 = vpop.f32.mrf.mxu0 }
 0x452   : > { %v2043_v8 = vld [vmem:[%s2394_s19 + $0x10] sm:$0xff] }
 0x454   : > { %v1348_v9 = vpop.f32.mrf.mxu1 }
 0x455   : > { %v2042_v9 = vld [vmem:[%s2394_s19 + $0x8] sm:$0xff] }
 0x459   : > { %v1365_v10 = vpop.f32.mrf.mxu2 }
 0x45a   : > { %v2081_v11 = vpack.i.bf16 %v1365_v10, %v1346_v6  ;;  %v2044_v6 = vld [vmem:[%s2394_s19 + $0x18] sm:$0xff]  ;;  %v2094_v10 = vld [vmem:[%s865_s21] ss:$0 sm:$0xff] }
 0x45b   : > { %1576 = vmatpush.bf16.msrb.mxu1 %v2044_v6 }
 0x45c   : > { %2082 = vrot.lane.b32.xlu0 %v2081_v11, %s2191_s26  ;;  %s2666_s26 = sld [smem:[#allocation21_spill]] (!%p2010_p6) }
 0x45f   : > { %1577 = vmatpush.bf16.msrb.mxu1 %v2043_v8 }
 0x461   : > { %v1367_v13 = vpop.f32.mrf.mxu2 }
 0x462   : > { %v2041_v13 = vld [vmem:[%s2394_s19] sm:$0xff] }
 0x463   : > { %1578 = vmatpush.bf16.msrb.mxu1 %v2042_v9 }
 0x467   : > { %1579 = vmatpush.bf16.msrb.mxu1 %v2041_v13 }
 0x4ce   : > { %v2083_v0 = vpop.permute.xlu0 %2082 }
 0x4cf   : > { %v2085_v15 = vunpack.i.h.bf16 %v2083_v0  ;;  %v2084_v16 = vunpack.i.l.bf16 %v2083_v0 }
 0x4d1   : > { %v1377_v17 = vsel %vm1114_vm8, %v1308_v63, %v2084_v16  ;;  %v1378_v18 = vsel %vm1114_vm8, %v1327_v5, %v2085_v15 }
 0x4d2   : > { %v1379_v19 = vpack.c.bf16 %v1378_v18, %v1377_v17 }
 0x4d4   : > { %1983 = vmatmul.msk.bf16.vlgmr.msra.gmra.mxu3 %vm908_vm0, %v1379_v19 }
 0x557   : > { %v1412_v21 = vpop.f32.mrf.mxu3 }
 0x558   : > { %v1413_v22 = vadd.f32 %v2091_v20, %v1412_v21 }
 0x55a   : > { %v2517_v23 = vadd.f32 %v1413_v22, %v2407_v2 }
 0x55c   : > { %v1421_v24 = vsel %vm908_vm0, %v2517_v23, 0.0 }
 0x55d   : > { %1422 = vadd.xlane.f32.xlu1 %v1421_v24 }
 0x55f   : > { %v1414_v25 = vpop.f32.mrf.mxu3 }
 0x560   : > { %v1415_v26 = vadd.f32 %v2091_v20, %v1414_v25 }
 0x562   : > { %v2522_v27 = vadd.f32 %v1415_v26, %v2411_v4 }
 0x564   : > { %v1424_v28 = vsel %vm908_vm0, %v2522_v27, 0.0 }
 0x565   : > { %1425 = vadd.xlane.f32.xlu2 %v1424_v28 }
 0x5d0   : > { %v1423_v29 = vpop.xlane.xlu1 %1422 }
 0x5d1   : > { %v1427_v30 = vmul.f32 %v1423_v29, %v2415_v12 }
 0x5d3   : > { %v1429_v2 = vsub.f32 %v2517_v23, %v1427_v30 }
 0x5d5   : > { %v1431_v31 = vmul.f32 %v1429_v2, %v1429_v2 }
 0x5d7   : > { %v1433_v32 = vsel %vm908_vm0, %v1431_v31, 0.0 }
 0x5d8   : > { %v1426_v33 = vpop.xlane.xlu2 %1425  ;;  %1434 = vadd.xlane.f32.xlu0 %v1433_v32 }
 0x5d9   : > { %v1428_v34 = vmul.f32 %v1426_v33, %v2415_v12 }
 0x5db   : > { %v1430_v4 = vsub.f32 %v2522_v27, %v1428_v34 }
 0x5dd   : > { %v1432_v35 = vmul.f32 %v1430_v4, %v1430_v4 }
 0x5df   : > { %v1436_v7 = vsel %vm908_vm0, %v1432_v35, 0.0  ;;  %v2095_v35 = vld [vmem:[%s873_s22] ss:$0 sm:$0xff] }
 0x5e0   : > { %1437 = vadd.xlane.f32.xlu1 %v1436_v7 }
 0x64b   : > { %v1435_v37 = vpop.xlane.xlu0 %1434 }
 0x64c   : > { %v1439_v38 = vmul.f32 %v1435_v37, %v2415_v12 }
 0x64e   : > { %v1441_v39 = vadd.f32 1e-05, %v1439_v38 }
 0x650   : > { %2118 = vrsqrt.f32 %v1441_v39  ;;  %vm1449_vm9 = vweird.f32 %v1441_v39 }
 0x653   : > { %v1438_v41 = vpop.xlane.xlu1 %1437 }
 0x654   : > { %v1440_v42 = vmul.f32 %v1438_v41, %v2415_v12 }
 0x656   : > { %v2119_v43 = vpop.eup %2118  ;;  %v1442_v44 = vadd.f32 1e-05, %v1440_v42 }
 0x657   : > { %v1444_v45 = vmul.f32 %v2119_v43, %v1441_v39  ;;  %vm1450_vm8 = vweird.f32 %v2119_v43 }
 0x658   : > { %2120 = vrsqrt.f32 %v1442_v44  ;;  %vm1451_vm10 = vmor %vm1449_vm9, %vm1450_vm8  ;;  %vm1459_vm1 = vweird.f32 %v1442_v44 }
 0x659   : > { %v1445_v46 = vmul.f32 %v2119_v43, %v1444_v45 }
 0x65b   : > { %v1446_v47 = vmul.f32 0.5, %v1445_v46 }
 0x65d   : > { %v1447_v48 = vsub.f32 1.5, %v1446_v47 }
 0x65e   : > { %v2121_v49 = vpop.eup %2120 }
 0x65f   : > { %v1448_v50 = vmul.f32 %v2119_v43, %v1447_v48  ;;  %v1454_v51 = vmul.f32 %v2121_v49, %v1442_v44  ;;  %vm1460_vm15 = vweird.f32 %v2121_v49 }
 0x660   : > { %vm1461_vm2 = vmor %vm1459_vm1, %vm1460_vm15 }
 0x661   : > { %v1455_v52 = vmul.f32 %v2121_v49, %v1454_v51  ;;  %v1452_v53 = vsel %vm1451_vm10, %v2119_v43, %v1448_v50 }
 0x662   : > { %v1463_v57 = vmul.f32 %v1452_v53, %v1429_v2 }
 0x663   : > { %v1456_v54 = vmul.f32 0.5, %v1455_v52 }
 0x664   : > { %v1468_v61 = vmul.f32 %v2092_v56, %v1463_v57 }
 0x665   : > { %v1457_v55 = vsub.f32 1.5, %v1456_v54 }
 0x666   : > { %v1473_v1 = vadd.f32 %v2093_v60, %v1468_v61 }
 0x667   : > { %v1458_v58 = vmul.f32 %v2121_v49, %v1457_v55 }
 0x669   : > { %v1462_v59 = vsel %vm1461_vm2, %v2121_v49, %v1458_v58 }
 0x66a   : > { %v1464_v62 = vmul.f32 %v1462_v59, %v1430_v4 }
 0x66c   : > { %v1469_v63 = vmul.f32 %v2092_v56, %v1464_v62 }
 0x66e   : > { %v1474_v3 = vadd.f32 %v2093_v60, %v1469_v63 }
 0x670   : > { %v1475_v5 = vpack.c.bf16 %v1474_v3, %v1473_v1 }
 0x672   : > { %1992 = vmatmul.msk.bf16.vlgmr.msrb.gmra.mxu0 %vm908_vm0, %v1475_v5 }
 0x6ef   : > { %v1508_v11 = vpop.f32.mrf.mxu0 }
 0x6f0   : > { %v1509_v14 = vadd.f32 %v2094_v10, %v1508_v11 }
 0x6f2   : > { %v1513_v0 = vmul.f32 %v1509_v14, %v1509_v14 }
 0x6f4   : > { %v1515_v15 = vmul.f32 %v1513_v0, %v1509_v14 }
 0x6f6   : > { %v1517_v16 = vmul.f32 0.044715, %v1515_v15 }
 0x6f7   : > { %v1510_v17 = vpop.f32.mrf.mxu0 }
 0x6f8   : > { %v1519_v18 = vadd.f32 %v1517_v16, %v1509_v14  ;;  %v1511_v19 = vadd.f32 %v2094_v10, %v1510_v17 }
 0x6fa   : > { %v1521_v20 = vmul.f32 0.7978846, %v1519_v18  ;;  %v1514_v21 = vmul.f32 %v1511_v19, %v1511_v19 }
 0x6fc   : > { %v1516_v22 = vmul.f32 %v1514_v21, %v1511_v19  ;;  %2122 = vtanh.f32 %v1521_v20 }
 0x6fe   : > { %v1518_v24 = vmul.f32 0.044715, %v1516_v22 }
 0x700   : > { %v1520_v25 = vadd.f32 %v1518_v24, %v1511_v19 }
 0x702   : > { %v1522_v26 = vmul.f32 0.7978846, %v1520_v25  ;;  %v2123_v28 = vpop.eup %2122 }
 0x703   : > { %v1525_v29 = vadd.f32 1.0, %v2123_v28 }
 0x704   : > { %2124 = vtanh.f32 %v1522_v26 }
 0x705   : > { %v1527_v2 = vmul.f32 0.5, %v1525_v29 }
 0x707   : > { %v1529_v33 = vmul.f32 %v1527_v2, %v1509_v14 }
 0x70a   : > { %v2125_v30 = vpop.eup %2124 }
 0x70b   : > { %v1526_v31 = vadd.f32 1.0, %v2125_v30 }
 0x70d   : > { %v1528_v32 = vmul.f32 0.5, %v1526_v31 }
 0x70f   : > { %v1530_v34 = vmul.f32 %v1528_v32, %v1511_v19 }
 0x711   : > { %v1531_v4 = vpack.c.bf16 %v1530_v34, %v1529_v33 }
 0x713   : > { %2009 = vmatmul.msk.bf16.vlgmr.msrb.gmra.mxu1 %vm1568_vm3, %v1531_v4 }
 0x790   : > { %v1581_v7 = vpop.f32.mrf.mxu1 }
 0x791   : > { %v1582_v36 = vadd.f32 %v2095_v35, %v1581_v7 }
 0x793   : > { %v1586_v37 = vadd.f32 %v1582_v36, %v2517_v23 }
 0x795   : > { %1588 = vst.msk [vmem:[#allocation2] sm:$0xff] %vm908_vm0, %v1586_v37 }
 0x798   : > { %v1583_v38 = vpop.f32.mrf.mxu1 }
 0x799   : > { %v1584_v39 = vadd.f32 %v2095_v35, %v1583_v38  ;;  %1593 = sbr.rel (%p2010_p6) target bundleno = 2373 (0x945), region = 127 }
 0x79b   : > { %v1587_v40 = vadd.f32 %v1584_v39, %v2522_v27 }
 0x79d   : > { %1589 = vst.msk [vmem:[#allocation2 + $0x8] sm:$0xff] %vm908_vm0, %v1587_v40 }
 0x79e   : > { %v1598_v41 = vrot.slane %v1587_v40, 7  ;;  %vm1599_vm4 = vcmask 1041409   ;;  %vm1602_vm5 = vcmask 254976   ;;  %v2046_v52 = vld [vmem:[%s2665_s9 + $0x8] sm:$0xff]  ;;  %v2045_v53 = vld [vmem:[%s2665_s9] sm:$0xff]  ;;  %vm1698_vm12 = vcmask 25600  }
 0x79f   : > { %1691 = vmatpush.bf16.msra.mxu0 %v2046_v52  ;;  %v2126_v63 = vld [vmem:[%s2666_s26] ss:$0 sm:$0xff] }
 0x7a0   : > { %v1600_v42 = vsel %vm1599_vm4, %v1598_v41, %v1586_v37  ;;  %v2128_v21 = vld [vmem:[%s2668_s4] ss:$0 sm:$0xff] }
 0x7a1   : > { %v1603_v43 = vsel %vm1602_vm5, %v1600_v42, 0.0 }
 0x7a2   : > { %1604 = vadd.xlane.f32.xlu0 %v1603_v43 }
 0x7a3   : > { %1692 = vmatpush.bf16.msra.mxu0 %v2045_v53 }
 0x815   : > { %v1605_v44 = vpop.xlane.xlu0 %1604 }
 0x816   : > { %v1606_v23 = vmul.f32 %v1605_v44, %v2415_v12 }
 0x818   : > { %v1608_v45 = vrot.slane %v1606_v23, 1  ;;  %v1611_v46 = vsub.f32 %v1586_v37, %v1606_v23 }
 0x81a   : > { %v1612_v47 = vsub.f32 %v1587_v40, %v1608_v45  ;;  %v1613_v27 = vmul.f32 %v1611_v46, %v1611_v46 }
 0x81c   : > { %v1614_v48 = vmul.f32 %v1612_v47, %v1612_v47 }
 0x81e   : > { %v1617_v49 = vrot.slane %v1614_v48, 7 }
 0x820   : > { %v1618_v50 = vsel %vm1599_vm4, %v1617_v49, %v1613_v27 }
 0x821   : > { %v1620_v51 = vsel %vm1602_vm5, %v1618_v50, 0.0 }
 0x822   : > { %1621 = vadd.xlane.f32.xlu0 %v1620_v51 }
 0x895   : > { %v1622_v54 = vpop.xlane.xlu0 %1621 }
 0x896   : > { %v1623_v55 = vmul.f32 %v1622_v54, %v2415_v12  ;;  %v2127_v12 = vld [vmem:[%s2667_s30] ss:$0 sm:$0xff] }
 0x898   : > { %v1624_v56 = vadd.f32 1e-05, %v1623_v55 }
 0x89a   : > { %2129 = vrsqrt.f32 %v1624_v56  ;;  %vm1631_vm7 = vweird.f32 %v1624_v56 }
 0x8a0   : > { %v2130_v57 = vpop.eup %2129 }
 0x8a1   : > { %v1626_v58 = vmul.f32 %v2130_v57, %v1624_v56  ;;  %vm1632_vm6 = vweird.f32 %v2130_v57 }
 0x8a2   : > { %vm1633_vm11 = vmor %vm1631_vm7, %vm1632_vm6 }
 0x8a3   : > { %v1627_v59 = vmul.f32 %v2130_v57, %v1626_v58 }
 0x8a5   : > { %v1628_v60 = vmul.f32 0.5, %v1627_v59 }
 0x8a7   : > { %v1629_v61 = vsub.f32 1.5, %v1628_v60 }
 0x8a9   : > { %v1630_v62 = vmul.f32 %v2130_v57, %v1629_v61 }
 0x8ab   : > { %v1634_v1 = vsel %vm1633_vm11, %v2130_v57, %v1630_v62 }
 0x8ac   : > { %v1636_v3 = vrot.slane %v1634_v1, 1  ;;  %v1639_v5 = vmul.f32 %v1634_v1, %v1611_v46 }
 0x8ae   : > { %v1640_v6 = vmul.f32 %v1636_v3, %v1612_v47  ;;  %v1644_v8 = vmul.f32 %v2126_v63, %v1639_v5 }
 0x8b0   : > { %v1645_v9 = vmul.f32 %v2126_v63, %v1640_v6  ;;  %v1649_v10 = vadd.f32 %v2127_v12, %v1644_v8 }
 0x8b2   : > { %v1650_v11 = vadd.f32 %v2127_v12, %v1645_v9  ;;  %v1651_v13 = vmax.f32 %v1649_v10, 0.0 }
 0x8b4   : > { %v1652_v14 = vmax.f32 %v1650_v11, 0.0  ;;  %v1653_v0 = vpack.c.bf16 %v1651_v13, %v1651_v13 }
 0x8b6   : > { %v1654_v15 = vpack.c.bf16 %v1652_v14, %v1652_v14  ;;  %v1665_v17 = vunpack.c.l.b16 %v1653_v0 }
 0x8b8   : > { %v1666_v16 = vunpack.c.l.b16 %v1654_v15 }
 0x8ba   : > { %v1667_v18 = vrot.slane %v1666_v16, 7 }
 0x8bc   : > { %v1668_v19 = vsel %vm1599_vm4, %v1667_v18, %v1665_v17 }
 0x8bd   : > { %v1669_v20 = vpack.c.b16 %v1668_v19, %v1668_v19 }
 0x8bf   : > { %2019 = vmatmul.msk.bf16.vlgmr.msra.gmra.mxu0 %vm908_vm0, %v1669_v20 }
 0x93c   : > { %v1694_v22 = vpop.f32.mrf.mxu0 }
 0x93d   : > { %v1695_v24 = vadd.f32 %v2128_v21, %v1694_v22 }
 0x93f   : > { %1699 = vst.msk [vmem:[#allocation4] sm:$0x3] %vm1698_vm12, %v1695_v24 }
 0x944   : > { %v1696_v25 = vpop.f32.mrf.mxu0 }
 0x945 PF: > { %s2669_s23 = sld [smem:[#allocation11_spill]]  ;;  %s2192_s25 = smov [#allocation4]  }
 0x946   : > { %s2671_s21 = sld [smem:[#allocation25_spill]]  ;;  %s1708_s28 = sshll.u32 %s2192_s25, 4  ;;  %s1709_s28 = int_to_ptr.vmem [resolvable:$true] %s1708_s28 }
 0x94b   : > { %s2670_s7 = sadd.s32 4294967295, %s2669_s23  }
 0x94c   : > { %p2051_p7 = scmp.eq.s32.totalorder %s2670_s7, 1  ;;  %s1710_s19 = sshll.u32 %s2671_s21, 4  ;;  %s1711_s19 = int_to_ptr.hbm [resolvable:$true] %s1710_s19 }
 0x94e   : > { %2048 = dma.vmem_to_hbm [thread:$0]  (%p2051_p7), %s1709_s28, 32, %s1711_s19, [#allocation5]  }
 0x94f   : > { %2174 = dma.done.wait (%p2051_p7), [#allocation5], 32  }
 0x950   : > { %2176 = vsyncadd (%p2051_p7), [#allocation5], 4294967264 }
 0x951 PF: > { %s2672_s22 = sld [smem:[#allocation11_spill]] }
 0x952   : > { %s2673_s2 = sld [smem:[#allocation10_spill]] }
 0x953   : > { %s2674_s25 = sld [smem:[#allocation12_spill]] }
 0x957   : > { %s32_s26 = sadd.s32 1, %s2672_s22  }
 0x958   : > { %p29_p8 = scmp.ge.s32.totalorder %s32_s26, 4  }
 0x95a   :  { %31 = sbr.rel (!%p29_p8) target bundleno = 16 (0x10), region = 205 }
 0x95f   :  { %1724 = vsyncpa [#allocation5], 1 }
 0x960   :  { %1726 = vsyncpa [#allocation5 + $0x1], 1 }
 0x961   :  { %1727 = vsyncmov [#allocation3] }
 0x964   :  { %s1728_s20 = vpop.sfrf %1727 }
 0x965   :  { %p2024_p9 = scmp.ne.s32.totalorder %s1728_s20, 0 }
 0x967   :  { %1732 = shalt.err (%p2024_p9)  }

</bundles_post_ra>
